<compile_context>
chip_gen: v7x
topology: tpu7x:2x2x1
jax: 0.10.0
libtpu: 0.0.40
codegen_flags: <defaults>
</compile_context>

<pallas_src>
import functools
import math

import jax
import jax.numpy as jnp
import numpy as np
from jax.experimental import pallas as pl
from jax.experimental.pallas import tpu as pltpu


# ----------------------------- Pallas kernels -----------------------------

def fused_edge_msg_kernel(xr_ref, xc_ref, ea_ref, col_ref,
                          ew1xr_ref, ew1xc_ref, ew1ea_ref, eb1_ref,
                          ew2_ref, eb2_ref,
                          mwxr_ref, mwe_ref, mb_ref,
                          e_out_ref, agg_ref, deg_ref,
                          *, node_chunk):
    """Per edge tile (grid = (edge_splits, edge_tiles_per_split)):

         e_new = Lin2(relu(Lin1_xr(xr) + Lin1_xc(xc) + Lin1_ea(ea)))
         msg   = relu(LinM_xr(xr) + LinM_e(e_new))
         agg  += onehot(col) @ msg      (chunked over the node axis)
         deg  += onehot(col) @ 1

    agg_ref / deg_ref are this core-split's partial sums, VMEM-resident across
    the inner (edge) grid axis.
    """
    e = pl.program_id(1)

    @pl.when(e == 0)
    def _init():
        agg_ref[...] = jnp.zeros_like(agg_ref)
        deg_ref[...] = jnp.zeros_like(deg_ref)

    f32, bf16 = jnp.float32, jnp.bfloat16
    xr = xr_ref[...].astype(bf16)
    xc = xc_ref[...].astype(bf16)
    ea = ea_ref[...].astype(bf16)

    # ---- edge model: split-weight matmuls (no lane concat), bf16 x bf16 -> f32 ----
    h = (jnp.dot(xr, ew1xr_ref[...], preferred_element_type=f32)
         + jnp.dot(xc, ew1xc_ref[...], preferred_element_type=f32)
         + jnp.dot(ea, ew1ea_ref[...], preferred_element_type=f32)
         + eb1_ref[...])
    h = jnp.maximum(h, 0.0)
    e_new = jnp.dot(h.astype(bf16), ew2_ref[...],
                    preferred_element_type=f32) + eb2_ref[...]
    # TODO(synk): E=16 / D=32 output lane widths hit masked vst stores; pad the
    # output feature dims to 128 lanes if writeback ever shows in the profile.
    e_out_ref[...] = e_new.astype(e_out_ref.dtype)

    # ---- message MLP (fused: e_new stays in VMEM, msg never touches HBM) ----
    msg = (jnp.dot(xr, mwxr_ref[...], preferred_element_type=f32)
           + jnp.dot(e_new.astype(bf16), mwe_ref[...], preferred_element_type=f32)
           + mb_ref[...])
    msg = jnp.maximum(msg, 0.0)                               # [tm, H] f32
    msg_bf = msg.astype(bf16)

    # ---- scatter-sum + degree, chunked over the node axis ----
    tm = msg.shape[0]
    n_pad = agg_ref.shape[0]
    n_chunks = n_pad // node_chunk
    col_row = col_ref[...]                                    # [1, tm] int32, lane-dense
    # iota hoisted out of the chunk loop; compare against (col - chunk_start).
    iota = jax.lax.broadcasted_iota(jnp.int32, (node_chunk, tm), 0)

    @pl.loop(0, n_chunks)
    def _chunk(c):
        start = pl.multiple_of(c * node_chunk, node_chunk)
        onehot_f32 = (iota == (col_row - start)).astype(f32)  # [NC, tm]
        # 0/1 are exact in bf16 -> scatter matmul on the MXU at bf16 rate.
        agg_ref[pl.ds(start, node_chunk), :] += jnp.dot(
            onehot_f32.astype(bf16), msg_bf, preferred_element_type=f32)
        deg_ref[pl.ds(start, node_chunk), :] += jnp.sum(
            onehot_f32, axis=1, keepdims=True)


def node_mlp_kernel(x_ref, agg_ref, deg_ref,
                    nw1x_ref, nw1a_ref, nb1_ref, nw2_ref, nb2_ref,
                    out_ref):
    """x_new = Lin2(relu(Lin1_x(x) + Lin1_a(agg_mean)))

    agg_ref [S, tn, H] / deg_ref [S, tn, 1] hold per-core-split partial sums.
    """
    f32, bf16 = jnp.float32, jnp.bfloat16
    agg_sum = jnp.sum(agg_ref[...], axis=0)                   # [tn, H]
    deg = jnp.sum(deg_ref[...], axis=0)                       # [tn, 1]
    agg = agg_sum * pl.reciprocal(jnp.maximum(deg, 1.0), approx=True)  # mean
    h = (jnp.dot(x_ref[...].astype(bf16), nw1x_ref[...], preferred_element_type=f32)
         + jnp.dot(agg.astype(bf16), nw1a_ref[...], preferred_element_type=f32)
         + nb1_ref[...])
    h = jnp.maximum(h, 0.0)
    out = jnp.dot(h.astype(bf16), nw2_ref[...],
                  preferred_element_type=f32) + nb2_ref[...]
    out_ref[...] = out.astype(out_ref.dtype)


# ----------------------------- wrapper -----------------------------

def _const_spec(shape):
    # VMEM-resident block (weights / biases): same block for every grid step.
    return pl.BlockSpec(shape, lambda *_: (0,) * len(shape))


def _round_up(a, b):
    return ((a + b - 1) // b) * b


# Scoped VMEM ceiling: safe on v7x (64 MiB/TC physical); v5e/v6e could go higher.
_VMEM_LIMIT = 48 * 1024 * 1024


@functools.partial(jax.jit,
                   static_argnames=("tm_edges", "tn_nodes", "node_chunk",
                                    "edge_splits"))
def meta_layer_forward(x, edge_index, edge_attr, params, *,
                       tm_edges=512, tn_nodes=512, node_chunk=512,
                       edge_splits=2):
    """Pallas-backed MetaLayer.forward: returns (x_new, edge_attr_new)."""
    N, D = x.shape
    M, E = edge_attr.shape
    H = params["e_b1"].shape[-1]

    assert tm_edges % 8 == 0 and tn_nodes % 8 == 0 and node_chunk % 8 == 0
    tm, tn = tm_edges, tn_nodes
    S = edge_splits
    m_pad = _round_up(M, S * tm)
    # n_pad must be a multiple of both the node tile and the scatter chunk.
    n_pad = _round_up(N, tn * node_chunk // math.gcd(tn, node_chunk))
    nc = node_chunk
    tiles_per_split = m_pad // (S * tm)

    row = edge_index[0].astype(jnp.int32)
    col = edge_index[1].astype(jnp.int32)

    pad_e = m_pad - M
    if pad_e:
        row_g = jnp.pad(row, (0, pad_e))                         # pad edges read node 0
        col_g = jnp.pad(col, (0, pad_e))
        col_s = jnp.pad(col, (0, pad_e), constant_values=n_pad)  # sentinel: matches no node
        ea_p = jnp.pad(edge_attr, ((0, pad_e), (0, 0)))
    else:
        row_g, col_g, col_s, ea_p = row, col, col, edge_attr

    # Gather once, directly at the padded edge count (no [M, D] pad copies).
    x_row_p = x[row_g]                                           # [m_pad, D]
    x_col_p = x[col_g]                                           # [m_pad, D]
    # TODO(synk): for graphs where x comfortably fits in VMEM, pass x with a
    # constant-index BlockSpec and gather in-kernel instead of via XLA gather.
    col_lane = col_s[None, :]                                    # [1, m_pad] lane-dense

    pad_n = n_pad - N
    x_p = jnp.pad(x, ((0, pad_n), (0, 0))) if pad_n else x

    # Split weights so the kernels never concatenate along the lane axis, and
    # pre-cast weight matrices to bf16 once (MXU-native); biases stay f32.
    bf16 = jnp.bfloat16
    ew1 = params["e_w1"]
    ew1_xr = ew1[:D].astype(bf16)
    ew1_xc = ew1[D:2 * D].astype(bf16)
    ew1_ea = ew1[2 * D:].astype(bf16)
    ew2 = params["e_w2"].astype(bf16)
    mw = params["m_w"]
    mw_xr, mw_e = mw[:D].astype(bf16), mw[D:].astype(bf16)
    nw1 = params["n_w1"]
    nw1_x, nw1_a = nw1[:D].astype(bf16), nw1[D:].astype(bf16)
    nw2 = params["n_w2"].astype(bf16)

    # ---------------- fused edge-update + message + aggregation ----------------
    def etile(c, e):
        return (c * tiles_per_split + e, 0)

    grid_e = (S, tiles_per_split)
    fused_in_specs = [
        pl.BlockSpec((tm, D), etile),                    # x[row] tile
        pl.BlockSpec((tm, D), etile),                    # x[col] tile
        pl.BlockSpec((tm, E), etile),                    # edge_attr tile
        pl.BlockSpec((1, tm),                            # col indices (lane-dense)
                     lambda c, e: (0, c * tiles_per_split + e)),
        _const_spec((D, H)), _const_spec((D, H)), _const_spec((E, H)),
        _const_spec((1, H)),
        _const_spec((H, E)), _const_spec((1, E)),
        _const_spec((D, H)), _const_spec((E, H)), _const_spec((1, H)),
    ]
    fused_out_specs = (
        pl.BlockSpec((tm, E), etile),                    # edge_attr_new tile
        pl.BlockSpec((n_pad, H), lambda c, e: (c, 0)),   # per-split agg partial
        pl.BlockSpec((n_pad, 1), lambda c, e: (c, 0)),   # per-split degree partial
    )
    flops_fused = (2 * m_pad * ((2 * D + E) * H + H * E + (D + E) * H)
                   + 2 * m_pad * n_pad * H)
    bytes_fused = (4 * (2 * m_pad * D + 2 * m_pad * E + m_pad
                        + S * n_pad * (H + 1))
                   + 2 * ((2 * D + E) * H + H * E + (D + E) * H)
                   + 4 * (2 * H + E))

    e_new_p, agg_part, deg_part = pl.pallas_call(
        functools.partial(fused_edge_msg_kernel, node_chunk=nc),
        grid=grid_e,
        in_specs=fused_in_specs,
        out_specs=fused_out_specs,
        out_shape=(jax.ShapeDtypeStruct((m_pad, E), edge_attr.dtype),
                   jax.ShapeDtypeStruct((S * n_pad, H), jnp.float32),
                   jax.ShapeDtypeStruct((S * n_pad, 1), jnp.float32)),
        compiler_params=pltpu.CompilerParams(
            dimension_semantics=("parallel", "arbitrary"),
            vmem_limit_bytes=_VMEM_LIMIT),
        cost_estimate=pl.CostEstimate(flops=flops_fused, transcendentals=0,
                                      bytes_accessed=bytes_fused),
    )(x_row_p, x_col_p, ea_p, col_lane,
      ew1_xr, ew1_xc, ew1_ea, params["e_b1"], ew2, params["e_b2"],
      mw_xr, mw_e, params["m_b"])

    # Free reshapes (row-major contiguous) to expose the split axis.
    agg3 = agg_part.reshape(S, n_pad, H)
    deg3 = deg_part.reshape(S, n_pad, 1)

    # ---------------- node update MLP ----------------
    grid_n = (n_pad // tn,)
    node_in_specs = [
        pl.BlockSpec((tn, D), lambda i: (i, 0)),        # x tile
        pl.BlockSpec((S, tn, H), lambda i: (0, i, 0)),  # agg partials tile
        pl.BlockSpec((S, tn, 1), lambda i: (0, i, 0)),  # degree partials tile
        _const_spec((D, H)), _const_spec((H, H)), _const_spec((1, H)),
        _const_spec((H, D)), _const_spec((1, D)),
    ]
    flops_node = 2 * n_pad * (D * H + H * H + H * D)
    bytes_node = (4 * (n_pad * D + S * n_pad * (H + 1) + H + D + n_pad * D)
                  + 2 * (D * H + H * H + H * D))

    x_new_p = pl.pallas_call(
        node_mlp_kernel,
        grid=grid_n,
        in_specs=node_in_specs,
        out_specs=pl.BlockSpec((tn, D), lambda i: (i, 0)),
        out_shape=jax.ShapeDtypeStruct((n_pad, D), x.dtype),
        compiler_params=pltpu.CompilerParams(
            dimension_semantics=("parallel",),
            vmem_limit_bytes=_VMEM_LIMIT),
        cost_estimate=pl.CostEstimate(flops=flops_node, transcendentals=0,
                                      bytes_accessed=bytes_node),
    )(x_p, agg3, deg3,
      nw1_x, nw1_a, params["n_b1"], nw2, params["n_b2"])

    return x_new_p[:N], e_new_p[:M]


# ----------------------------- pure-JAX reference -----------------------------

def meta_layer_reference(x, edge_index, edge_attr, p):
    row, col = edge_index[0], edge_index[1]
    N, D = x.shape
    h = jnp.concatenate([x[row], x[col], edge_attr], axis=-1)
    h = jnp.maximum(h @ p["e_w1"] + p["e_b1"], 0.0)
    e_new = h @ p["e_w2"] + p["e_b2"]

    m = jnp.concatenate([x[row], e_new], axis=-1)
    msg = jnp.maximum(m @ p["m_w"] + p["m_b"], 0.0)
    H = msg.shape[-1]
    agg = jnp.zeros((N, H), x.dtype).at[col].add(msg)
    deg = jnp.zeros((N,), x.dtype).at[col].add(1.0)
    agg = agg / jnp.maximum(deg, 1.0)[:, None]

    n = jnp.concatenate([x, agg], axis=-1)
    h = jnp.maximum(n @ p["n_w1"] + p["n_b1"], 0.0)
    x_new = h @ p["n_w2"] + p["n_b2"]
    return x_new, e_new


# ----------------------------- main -----------------------------

if __name__ == "__main__":
    key = jax.random.PRNGKey(0)
    N, D = 64, 32      # nodes, node feature dim
    M, E = 512, 16     # edges, edge feature dim
    H = 32             # hidden dim

    ks = jax.random.split(key, 8)
    x = jax.random.normal(ks[0], (N, D), jnp.float32)
    edge_attr = jax.random.normal(ks[1], (M, E), jnp.float32)
    edge_index = jax.random.randint(ks[2], (2, M), 0, N, dtype=jnp.int32)

    def init(k, shape, fan_in):
        return jax.random.normal(k, shape, jnp.float32) * (1.0 / np.sqrt(fan_in))

    params = {
        # edge model: (2D + E) -> H -> E
        "e_w1": init(ks[3], (2 * D + E, H), 2 * D + E),
        "e_b1": jnp.zeros((1, H), jnp.float32),
        "e_w2": init(ks[4], (H, E), H),
        "e_b2": jnp.zeros((1, E), jnp.float32),
        # node model msg MLP: (D + E) -> H ; node MLP: (D + H) -> H -> D
        "m_w": init(ks[5], (D + E, H), D + E),
        "m_b": jnp.zeros((1, H), jnp.float32),
        "n_w1": init(ks[6], (D + H, H), D + H),
        "n_b1": jnp.zeros((1, H), jnp.float32),
        "n_w2": init(ks[7], (H, D), H),
        "n_b2": jnp.zeros((1, D), jnp.float32),
    }

    # Small tiles so the toy graph exercises both grid axes (2 core splits x
    # 2 edge tiles each), the in-kernel accumulator, the node-chunk loop and
    # two node tiles; real graphs use the defaults (512 / 512 / 512).
    x_out, e_out = meta_layer_forward(x, edge_index, edge_attr, params,
                                      tm_edges=128, tn_nodes=32,
                                      node_chunk=32, edge_splits=2)
    jax.block_until_ready((x_out, e_out))

    x_ref, e_ref = meta_layer_reference(x, edge_index, edge_attr, params)
    # bf16 MXU operands (f32 accumulation) -> tolerance loosened vs f32 reference.
    np.testing.assert_allclose(np.asarray(e_out), np.asarray(e_ref),
                               rtol=5e-2, atol=5e-2)
    np.testing.assert_allclose(np.asarray(x_out), np.asarray(x_ref),
                               rtol=5e-2, atol=5e-2)

    print("KERNEL_OK")
</pallas_src>

<mosaic_0001>
module attributes {stable_mosaic.version = 11 : i64} {
  func.func @fused_edge_msg_kernel(%arg0: i32, %arg1: i32, %arg2: memref<128x32xf32, #tpu.memory_space<vmem>>, %arg3: memref<128x32xf32, #tpu.memory_space<vmem>>, %arg4: memref<128x16xf32, #tpu.memory_space<vmem>>, %arg5: memref<1x128xi32, #tpu.memory_space<vmem>>, %arg6: memref<32x32xbf16, #tpu.memory_space<vmem>>, %arg7: memref<32x32xbf16, #tpu.memory_space<vmem>>, %arg8: memref<16x32xbf16, #tpu.memory_space<vmem>>, %arg9: memref<1x32xf32, #tpu.memory_space<vmem>>, %arg10: memref<32x16xbf16, #tpu.memory_space<vmem>>, %arg11: memref<1x16xf32, #tpu.memory_space<vmem>>, %arg12: memref<32x32xbf16, #tpu.memory_space<vmem>>, %arg13: memref<16x32xbf16, #tpu.memory_space<vmem>>, %arg14: memref<1x32xf32, #tpu.memory_space<vmem>>, %arg15: memref<128x16xf32, #tpu.memory_space<vmem>>, %arg16: memref<64x32xf32, #tpu.memory_space<vmem>>, %arg17: memref<64x1xf32, #tpu.memory_space<vmem>>) attributes {dimension_semantics = [#tpu.dimension_semantics<parallel>, #tpu.dimension_semantics<arbitrary>], iteration_bounds = array<i64: 2, 2>, scalar_prefetch = 0 : i64, scratch_operands = 0 : i64, tpu.core_type = #tpu.core_type<tc>, window_params = [{transform_indices = @transform_0, window_bounds = array<i64: 128, 32>}, {transform_indices = @transform_1, window_bounds = array<i64: 128, 32>}, {transform_indices = @transform_2, window_bounds = array<i64: 128, 16>}, {transform_indices = @transform_3, window_bounds = array<i64: 1, 128>}, {pipeline_mode = #tpu.pipeline_mode<synchronous>, transform_indices = @transform_4, window_bounds = array<i64: 32, 32>}, {pipeline_mode = #tpu.pipeline_mode<synchronous>, transform_indices = @transform_5, window_bounds = array<i64: 32, 32>}, {pipeline_mode = #tpu.pipeline_mode<synchronous>, transform_indices = @transform_6, window_bounds = array<i64: 16, 32>}, {pipeline_mode = #tpu.pipeline_mode<synchronous>, transform_indices = @transform_7, window_bounds = array<i64: 1, 32>}, {pipeline_mode = #tpu.pipeline_mode<synchronous>, transform_indices = @transform_8, window_bounds = array<i64: 32, 16>}, {pipeline_mode = #tpu.pipeline_mode<synchronous>, transform_indices = @transform_9, window_bounds = array<i64: 1, 16>}, {pipeline_mode = #tpu.pipeline_mode<synchronous>, transform_indices = @transform_10, window_bounds = array<i64: 32, 32>}, {pipeline_mode = #tpu.pipeline_mode<synchronous>, transform_indices = @transform_11, window_bounds = array<i64: 16, 32>}, {pipeline_mode = #tpu.pipeline_mode<synchronous>, transform_indices = @transform_12, window_bounds = array<i64: 1, 32>}, {transform_indices = @transform_13, window_bounds = array<i64: 128, 16>}, {transform_indices = @transform_14, window_bounds = array<i64: 64, 32>}, {transform_indices = @transform_15, window_bounds = array<i64: 64, 1>}]} {
    %c0_i32 = arith.constant 0 : i32
    %0 = arith.cmpi eq, %arg1, %c0_i32 : i32
    %1 = arith.extui %0 : i1 to i32
    %c0_i32_0 = arith.constant 0 : i32
    %2 = arith.cmpi ne, %1, %c0_i32_0 : i32
    scf.if %2 {
      %cst_37 = arith.constant 0.000000e+00 : f32
      %44 = vector.broadcast %cst_37 : f32 to vector<64x32xf32>
      %c0_38 = arith.constant 0 : index
      %c0_39 = arith.constant 0 : index
      %45 = vector.load %arg16[%c0_38, %c0_39] : memref<64x32xf32, #tpu.memory_space<vmem>>, vector<64x32xf32>
      tpu.vector_store %arg16[%c0_38, %c0_39], %44 {strides = array<i32>} : memref<64x32xf32, #tpu.memory_space<vmem>>, vector<64x32xf32>,
      %cst_40 = arith.constant 0.000000e+00 : f32
      %46 = vector.broadcast %cst_40 : f32 to vector<64x1xf32>
      %c0_41 = arith.constant 0 : index
      %c0_42 = arith.constant 0 : index
      %47 = vector.load %arg17[%c0_41, %c0_42] : memref<64x1xf32, #tpu.memory_space<vmem>>, vector<64x1xf32>
      tpu.vector_store %arg17[%c0_41, %c0_42], %46 {strides = array<i32>} : memref<64x1xf32, #tpu.memory_space<vmem>>, vector<64x1xf32>,
    } else {
    }
    %c0 = arith.constant 0 : index
    %c0_1 = arith.constant 0 : index
    %3 = vector.load %arg2[%c0, %c0_1] : memref<128x32xf32, #tpu.memory_space<vmem>>, vector<128x32xf32>
    %4 = arith.truncf %3 : vector<128x32xf32> to vector<128x32xbf16>
    %c0_2 = arith.constant 0 : index
    %c0_3 = arith.constant 0 : index
    %5 = vector.load %arg3[%c0_2, %c0_3] : memref<128x32xf32, #tpu.memory_space<vmem>>, vector<128x32xf32>
    %6 = arith.truncf %5 : vector<128x32xf32> to vector<128x32xbf16>
    %c0_4 = arith.constant 0 : index
    %c0_5 = arith.constant 0 : index
    %7 = vector.load %arg4[%c0_4, %c0_5] : memref<128x16xf32, #tpu.memory_space<vmem>>, vector<128x16xf32>
    %8 = arith.truncf %7 : vector<128x16xf32> to vector<128x16xbf16>
    %c0_6 = arith.constant 0 : index
    %c0_7 = arith.constant 0 : index
    %9 = vector.load %arg6[%c0_6, %c0_7] : memref<32x32xbf16, #tpu.memory_space<vmem>>, vector<32x32xbf16>
    %cst = arith.constant dense<0.000000e+00> : vector<128x32xf32>
    %10 = tpu.matmul %4, %9, %cst {dimension_numbers = #tpu.dot_dimension_numbers<[1], [0], [0], [1], [0, 0, 1, 1], [], []>} : vector<128x32xbf16>, vector<32x32xbf16>, vector<128x32xf32> -> vector<128x32xf32>
    %c0_8 = arith.constant 0 : index
    %c0_9 = arith.constant 0 : index
    %11 = vector.load %arg7[%c0_8, %c0_9] : memref<32x32xbf16, #tpu.memory_space<vmem>>, vector<32x32xbf16>
    %cst_10 = arith.constant dense<0.000000e+00> : vector<128x32xf32>
    %12 = tpu.matmul %6, %11, %cst_10 {dimension_numbers = #tpu.dot_dimension_numbers<[1], [0], [0], [1], [0, 0, 1, 1], [], []>} : vector<128x32xbf16>, vector<32x32xbf16>, vector<128x32xf32> -> vector<128x32xf32>
    %13 = arith.addf %10, %12 : vector<128x32xf32>
    %c0_11 = arith.constant 0 : index
    %c0_12 = arith.constant 0 : index
    %14 = vector.load %arg8[%c0_11, %c0_12] : memref<16x32xbf16, #tpu.memory_space<vmem>>, vector<16x32xbf16>
    %cst_13 = arith.constant dense<0.000000e+00> : vector<128x32xf32>
    %15 = tpu.matmul %8, %14, %cst_13 {dimension_numbers = #tpu.dot_dimension_numbers<[1], [0], [0], [1], [0, 0, 1, 1], [], []>} : vector<128x16xbf16>, vector<16x32xbf16>, vector<128x32xf32> -> vector<128x32xf32>
    %16 = arith.addf %13, %15 : vector<128x32xf32>
    %c0_14 = arith.constant 0 : index
    %c0_15 = arith.constant 0 : index
    %17 = vector.load %arg9[%c0_14, %c0_15] : memref<1x32xf32, #tpu.memory_space<vmem>>, vector<1x32xf32>
    %18 = vector.broadcast %17 : vector<1x32xf32> to vector<128x32xf32>
    %19 = arith.addf %16, %18 : vector<128x32xf32>
    %cst_16 = arith.constant 0.000000e+00 : f32
    %20 = vector.broadcast %cst_16 : f32 to vector<128x32xf32>
    %21 = arith.maximumf %19, %20 : vector<128x32xf32>
    %22 = arith.truncf %21 : vector<128x32xf32> to vector<128x32xbf16>
    %c0_17 = arith.constant 0 : index
    %c0_18 = arith.constant 0 : index
    %23 = vector.load %arg10[%c0_17, %c0_18] : memref<32x16xbf16, #tpu.memory_space<vmem>>, vector<32x16xbf16>
    %cst_19 = arith.constant dense<0.000000e+00> : vector<128x16xf32>
    %24 = tpu.matmul %22, %23, %cst_19 {dimension_numbers = #tpu.dot_dimension_numbers<[1], [0], [0], [1], [0, 0, 1, 1], [], []>} : vector<128x32xbf16>, vector<32x16xbf16>, vector<128x16xf32> -> vector<128x16xf32>
    %c0_20 = arith.constant 0 : index
    %c0_21 = arith.constant 0 : index
    %25 = vector.load %arg11[%c0_20, %c0_21] : memref<1x16xf32, #tpu.memory_space<vmem>>, vector<1x16xf32>
    %26 = vector.broadcast %25 : vector<1x16xf32> to vector<128x16xf32>
    %27 = arith.addf %24, %26 : vector<128x16xf32>
    %c0_22 = arith.constant 0 : index
    %c0_23 = arith.constant 0 : index
    %28 = vector.load %arg15[%c0_22, %c0_23] : memref<128x16xf32, #tpu.memory_space<vmem>>, vector<128x16xf32>
    tpu.vector_store %arg15[%c0_22, %c0_23], %27 {strides = array<i32>} : memref<128x16xf32, #tpu.memory_space<vmem>>, vector<128x16xf32>,
    %c0_24 = arith.constant 0 : index
    %c0_25 = arith.constant 0 : index
    %29 = vector.load %arg12[%c0_24, %c0_25] : memref<32x32xbf16, #tpu.memory_space<vmem>>, vector<32x32xbf16>
    %cst_26 = arith.constant dense<0.000000e+00> : vector<128x32xf32>
    %30 = tpu.matmul %4, %29, %cst_26 {dimension_numbers = #tpu.dot_dimension_numbers<[1], [0], [0], [1], [0, 0, 1, 1], [], []>} : vector<128x32xbf16>, vector<32x32xbf16>, vector<128x32xf32> -> vector<128x32xf32>
    %31 = arith.truncf %27 : vector<128x16xf32> to vector<128x16xbf16>
    %c0_27 = arith.constant 0 : index
    %c0_28 = arith.constant 0 : index
    %32 = vector.load %arg13[%c0_27, %c0_28] : memref<16x32xbf16, #tpu.memory_space<vmem>>, vector<16x32xbf16>
    %cst_29 = arith.constant dense<0.000000e+00> : vector<128x32xf32>
    %33 = tpu.matmul %31, %32, %cst_29 {dimension_numbers = #tpu.dot_dimension_numbers<[1], [0], [0], [1], [0, 0, 1, 1], [], []>} : vector<128x16xbf16>, vector<16x32xbf16>, vector<128x32xf32> -> vector<128x32xf32>
    %34 = arith.addf %30, %33 : vector<128x32xf32>
    %c0_30 = arith.constant 0 : index
    %c0_31 = arith.constant 0 : index
    %35 = vector.load %arg14[%c0_30, %c0_31] : memref<1x32xf32, #tpu.memory_space<vmem>>, vector<1x32xf32>
    %36 = vector.broadcast %35 : vector<1x32xf32> to vector<128x32xf32>
    %37 = arith.addf %34, %36 : vector<128x32xf32>
    %cst_32 = arith.constant 0.000000e+00 : f32
    %38 = vector.broadcast %cst_32 : f32 to vector<128x32xf32>
    %39 = arith.maximumf %37, %38 : vector<128x32xf32>
    %40 = arith.truncf %39 : vector<128x32xf32> to vector<128x32xbf16>
    %c0_33 = arith.constant 0 : index
    %c0_34 = arith.constant 0 : index
    %41 = vector.load %arg5[%c0_33, %c0_34] : memref<1x128xi32, #tpu.memory_space<vmem>>, vector<1x128xi32>
    %42 = tpu.iota {dimensions = array<i32: 0>} : vector<32x128xi32>
    %c0_i32_35 = arith.constant 0 : i32
    %c2_i32 = arith.constant 2 : i32
    %43 = arith.addi %c0_i32_35, %c2_i32 : i32
    %c1_i32 = arith.constant 1 : i32
    scf.for %arg18 = %c0_i32_35 to %43 step %c1_i32  : i32 {
      %c1_i32_37 = arith.constant 1 : i32
      %44 = arith.muli %arg18, %c1_i32_37 : i32
      %c0_i32_38 = arith.constant 0 : i32
      %45 = arith.addi %c0_i32_38, %44 : i32
      %c32_i32 = arith.constant 32 : i32
      %46 = arith.muli %45, %c32_i32 : i32
      %47 = tpu.assume_multiple %46, 32 : i32
      %48 = vector.broadcast %47 : i32 to vector<1x128xi32>
      %49 = arith.subi %41, %48 : vector<1x128xi32>
      %50 = vector.broadcast %49 : vector<1x128xi32> to vector<32x128xi32>
      %51 = arith.cmpi eq, %42, %50 : vector<32x128xi32>
      %52 = arith.extui %51 : vector<32x128xi1> to vector<32x128xi32>
      %53 = arith.sitofp %52 : vector<32x128xi32> to vector<32x128xf32>
      %54 = arith.index_cast %47 : i32 to index
      %c0_39 = arith.constant 0 : index
      %55 = vector.load %arg16[%54, %c0_39] : memref<64x32xf32, #tpu.memory_space<vmem>>, vector<32x32xf32>
      %56 = arith.truncf %53 : vector<32x128xf32> to vector<32x128xbf16>
      %cst_40 = arith.constant dense<0.000000e+00> : vector<32x32xf32>
      %57 = tpu.matmul %56, %40, %cst_40 {dimension_numbers = #tpu.dot_dimension_numbers<[1], [0], [0], [1], [0, 0, 1, 1], [], []>} : vector<32x128xbf16>, vector<128x32xbf16>, vector<32x32xf32> -> vector<32x32xf32>
      %58 = arith.addf %55, %57 : vector<32x32xf32>
      %59 = arith.index_cast %47 : i32 to index
      %c0_41 = arith.constant 0 : index
      %60 = vector.load %arg16[%59, %c0_41] : memref<64x32xf32, #tpu.memory_space<vmem>>, vector<32x32xf32>
      tpu.vector_store %arg16[%59, %c0_41], %58 {strides = array<i32>} : memref<64x32xf32, #tpu.memory_space<vmem>>, vector<32x32xf32>,
      %61 = arith.index_cast %47 : i32 to index
      %c0_42 = arith.constant 0 : index
      %62 = vector.load %arg17[%61, %c0_42] : memref<64x1xf32, #tpu.memory_space<vmem>>, vector<32x1xf32>
      %cst_43 = arith.constant dense<0.000000e+00> : vector<32xf32>
      %63 = vector.multi_reduction <add>, %53, %cst_43 [1] : vector<32x128xf32> to vector<32xf32>
      %64 = vector.shape_cast %63 : vector<32xf32> to vector<32x1xf32>
      %65 = arith.addf %62, %64 : vector<32x1xf32>
      %66 = arith.index_cast %47 : i32 to index
      %c0_44 = arith.constant 0 : index
      %67 = vector.load %arg17[%66, %c0_44] : memref<64x1xf32, #tpu.memory_space<vmem>>, vector<32x1xf32>
      tpu.vector_store %arg17[%66, %c0_44], %65 {strides = array<i32>} : memref<64x1xf32, #tpu.memory_space<vmem>>, vector<32x1xf32>,
    }
    %c2_i32_36 = arith.constant 2 : i32
    return
  }
  func.func @transform_0(%arg0: i32, %arg1: i32) -> (i32, i32) {
    %c2_i32 = arith.constant 2 : i32
    %0 = arith.muli %arg0, %c2_i32 : i32
    %1 = arith.addi %0, %arg1 : i32
    %c0_i32 = arith.constant 0 : i32
    %c0_i32_0 = arith.constant 0 : i32
    return %1, %c0_i32 : i32, i32
  }
  func.func @transform_1(%arg0: i32, %arg1: i32) -> (i32, i32) {
    %c2_i32 = arith.constant 2 : i32
    %0 = arith.muli %arg0, %c2_i32 : i32
    %1 = arith.addi %0, %arg1 : i32
    %c0_i32 = arith.constant 0 : i32
    %c0_i32_0 = arith.constant 0 : i32
    return %1, %c0_i32 : i32, i32
  }
  func.func @transform_2(%arg0: i32, %arg1: i32) -> (i32, i32) {
    %c2_i32 = arith.constant 2 : i32
    %0 = arith.muli %arg0, %c2_i32 : i32
    %1 = arith.addi %0, %arg1 : i32
    %c0_i32 = arith.constant 0 : i32
    %c0_i32_0 = arith.constant 0 : i32
    return %1, %c0_i32 : i32, i32
  }
  func.func @transform_3(%arg0: i32, %arg1: i32) -> (i32, i32) {
    %c2_i32 = arith.constant 2 : i32
    %0 = arith.muli %arg0, %c2_i32 : i32
    %1 = arith.addi %0, %arg1 : i32
    %c0_i32 = arith.constant 0 : i32
    %c0_i32_0 = arith.constant 0 : i32
    return %c0_i32, %1 : i32, i32
  }
  func.func @transform_4(%arg0: i32, %arg1: i32) -> (i32, i32) {
    %c0_i32 = arith.constant 0 : i32
    %c0_i32_0 = arith.constant 0 : i32
    %c0_i32_1 = arith.constant 0 : i32
    return %c0_i32, %c0_i32_0 : i32, i32
  }
  func.func @transform_5(%arg0: i32, %arg1: i32) -> (i32, i32) {
    %c0_i32 = arith.constant 0 : i32
    %c0_i32_0 = arith.constant 0 : i32
    %c0_i32_1 = arith.constant 0 : i32
    return %c0_i32, %c0_i32_0 : i32, i32
  }
  func.func @transform_6(%arg0: i32, %arg1: i32) -> (i32, i32) {
    %c0_i32 = arith.constant 0 : i32
    %c0_i32_0 = arith.constant 0 : i32
    %c0_i32_1 = arith.constant 0 : i32
    return %c0_i32, %c0_i32_0 : i32, i32
  }
  func.func @transform_7(%arg0: i32, %arg1: i32) -> (i32, i32) {
    %c0_i32 = arith.constant 0 : i32
    %c0_i32_0 = arith.constant 0 : i32
    %c0_i32_1 = arith.constant 0 : i32
    return %c0_i32, %c0_i32_0 : i32, i32
  }
  func.func @transform_8(%arg0: i32, %arg1: i32) -> (i32, i32) {
    %c0_i32 = arith.constant 0 : i32
    %c0_i32_0 = arith.constant 0 : i32
    %c0_i32_1 = arith.constant 0 : i32
    return %c0_i32, %c0_i32_0 : i32, i32
  }
  func.func @transform_9(%arg0: i32, %arg1: i32) -> (i32, i32) {
    %c0_i32 = arith.constant 0 : i32
    %c0_i32_0 = arith.constant 0 : i32
    %c0_i32_1 = arith.constant 0 : i32
    return %c0_i32, %c0_i32_0 : i32, i32
  }
  func.func @transform_10(%arg0: i32, %arg1: i32) -> (i32, i32) {
    %c0_i32 = arith.constant 0 : i32
    %c0_i32_0 = arith.constant 0 : i32
    %c0_i32_1 = arith.constant 0 : i32
    return %c0_i32, %c0_i32_0 : i32, i32
  }
  func.func @transform_11(%arg0: i32, %arg1: i32) -> (i32, i32) {
    %c0_i32 = arith.constant 0 : i32
    %c0_i32_0 = arith.constant 0 : i32
    %c0_i32_1 = arith.constant 0 : i32
    return %c0_i32, %c0_i32_0 : i32, i32
  }
  func.func @transform_12(%arg0: i32, %arg1: i32) -> (i32, i32) {
    %c0_i32 = arith.constant 0 : i32
    %c0_i32_0 = arith.constant 0 : i32
    %c0_i32_1 = arith.constant 0 : i32
    return %c0_i32, %c0_i32_0 : i32, i32
  }
  func.func @transform_13(%arg0: i32, %arg1: i32) -> (i32, i32) {
    %c2_i32 = arith.constant 2 : i32
    %0 = arith.muli %arg0, %c2_i32 : i32
    %1 = arith.addi %0, %arg1 : i32
    %c0_i32 = arith.constant 0 : i32
    %c0_i32_0 = arith.constant 0 : i32
    return %1, %c0_i32 : i32, i32
  }
  func.func @transform_14(%arg0: i32, %arg1: i32) -> (i32, i32) {
    %c0_i32 = arith.constant 0 : i32
    %c0_i32_0 = arith.constant 0 : i32
    return %arg0, %c0_i32 : i32, i32
  }
  func.func @transform_15(%arg0: i32, %arg1: i32) -> (i32, i32) {
    %c0_i32 = arith.constant 0 : i32
    %c0_i32_0 = arith.constant 0 : i32
    return %arg0, %c0_i32 : i32, i32
  }
}

module attributes {stable_mosaic.version = 11 : i64} {
  func.func @node_mlp_kernel(%arg0: i32, %arg1: memref<32x32xf32, #tpu.memory_space<vmem>>, %arg2: memref<2x32x32xf32, #tpu.memory_space<vmem>>, %arg3: memref<2x32x1xf32, #tpu.memory_space<vmem>>, %arg4: memref<32x32xbf16, #tpu.memory_space<vmem>>, %arg5: memref<32x32xbf16, #tpu.memory_space<vmem>>, %arg6: memref<1x32xf32, #tpu.memory_space<vmem>>, %arg7: memref<32x32xbf16, #tpu.memory_space<vmem>>, %arg8: memref<1x32xf32, #tpu.memory_space<vmem>>, %arg9: memref<32x32xf32, #tpu.memory_space<vmem>>) attributes {dimension_semantics = [#tpu.dimension_semantics<parallel>], iteration_bounds = array<i64: 2>, scalar_prefetch = 0 : i64, scratch_operands = 0 : i64, tpu.core_type = #tpu.core_type<tc>, window_params = [{transform_indices = @transform_0, window_bounds = array<i64: 32, 32>}, {transform_indices = @transform_1, window_bounds = array<i64: 2, 32, 32>}, {transform_indices = @transform_2, window_bounds = array<i64: 2, 32, 1>}, {pipeline_mode = #tpu.pipeline_mode<synchronous>, transform_indices = @transform_3, window_bounds = array<i64: 32, 32>}, {pipeline_mode = #tpu.pipeline_mode<synchronous>, transform_indices = @transform_4, window_bounds = array<i64: 32, 32>}, {pipeline_mode = #tpu.pipeline_mode<synchronous>, transform_indices = @transform_5, window_bounds = array<i64: 1, 32>}, {pipeline_mode = #tpu.pipeline_mode<synchronous>, transform_indices = @transform_6, window_bounds = array<i64: 32, 32>}, {pipeline_mode = #tpu.pipeline_mode<synchronous>, transform_indices = @transform_7, window_bounds = array<i64: 1, 32>}, {transform_indices = @transform_8, window_bounds = array<i64: 32, 32>}]} {
    %c0 = arith.constant 0 : index
    %c0_0 = arith.constant 0 : index
    %c0_1 = arith.constant 0 : index
    %0 = vector.load %arg2[%c0, %c0_0, %c0_1] : memref<2x32x32xf32, #tpu.memory_space<vmem>>, vector<2x32x32xf32>
    %cst = arith.constant dense<0.000000e+00> : vector<32x32xf32>
    %1 = vector.multi_reduction <add>, %0, %cst [0] : vector<2x32x32xf32> to vector<32x32xf32>
    %c0_2 = arith.constant 0 : index
    %c0_3 = arith.constant 0 : index
    %c0_4 = arith.constant 0 : index
    %2 = vector.load %arg3[%c0_2, %c0_3, %c0_4] : memref<2x32x1xf32, #tpu.memory_space<vmem>>, vector<2x32x1xf32>
    %cst_5 = arith.constant dense<0.000000e+00> : vector<32x1xf32>
    %3 = vector.multi_reduction <add>, %2, %cst_5 [0] : vector<2x32x1xf32> to vector<32x1xf32>
    %cst_6 = arith.constant 1.000000e+00 : f32
    %4 = vector.broadcast %cst_6 : f32 to vector<32x1xf32>
    %5 = arith.maximumf %3, %4 : vector<32x1xf32>
    %6 = tpu.reciprocal %5 {approx = true} : vector<32x1xf32> -> vector<32x1xf32>
    %7 = vector.broadcast %6 : vector<32x1xf32> to vector<32x32xf32>
    %8 = arith.mulf %1, %7 : vector<32x32xf32>
    %c0_7 = arith.constant 0 : index
    %c0_8 = arith.constant 0 : index
    %9 = vector.load %arg1[%c0_7, %c0_8] : memref<32x32xf32, #tpu.memory_space<vmem>>, vector<32x32xf32>
    %10 = arith.truncf %9 : vector<32x32xf32> to vector<32x32xbf16>
    %c0_9 = arith.constant 0 : index
    %c0_10 = arith.constant 0 : index
    %11 = vector.load %arg4[%c0_9, %c0_10] : memref<32x32xbf16, #tpu.memory_space<vmem>>, vector<32x32xbf16>
    %cst_11 = arith.constant dense<0.000000e+00> : vector<32x32xf32>
    %12 = tpu.matmul %10, %11, %cst_11 {dimension_numbers = #tpu.dot_dimension_numbers<[1], [0], [0], [1], [0, 0, 1, 1], [], []>} : vector<32x32xbf16>, vector<32x32xbf16>, vector<32x32xf32> -> vector<32x32xf32>
    %13 = arith.truncf %8 : vector<32x32xf32> to vector<32x32xbf16>
    %c0_12 = arith.constant 0 : index
    %c0_13 = arith.constant 0 : index
    %14 = vector.load %arg5[%c0_12, %c0_13] : memref<32x32xbf16, #tpu.memory_space<vmem>>, vector<32x32xbf16>
    %cst_14 = arith.constant dense<0.000000e+00> : vector<32x32xf32>
    %15 = tpu.matmul %13, %14, %cst_14 {dimension_numbers = #tpu.dot_dimension_numbers<[1], [0], [0], [1], [0, 0, 1, 1], [], []>} : vector<32x32xbf16>, vector<32x32xbf16>, vector<32x32xf32> -> vector<32x32xf32>
    %16 = arith.addf %12, %15 : vector<32x32xf32>
    %c0_15 = arith.constant 0 : index
    %c0_16 = arith.constant 0 : index
    %17 = vector.load %arg6[%c0_15, %c0_16] : memref<1x32xf32, #tpu.memory_space<vmem>>, vector<1x32xf32>
    %18 = vector.broadcast %17 : vector<1x32xf32> to vector<32x32xf32>
    %19 = arith.addf %16, %18 : vector<32x32xf32>
    %cst_17 = arith.constant 0.000000e+00 : f32
    %20 = vector.broadcast %cst_17 : f32 to vector<32x32xf32>
    %21 = arith.maximumf %19, %20 : vector<32x32xf32>
    %22 = arith.truncf %21 : vector<32x32xf32> to vector<32x32xbf16>
    %c0_18 = arith.constant 0 : index
    %c0_19 = arith.constant 0 : index
    %23 = vector.load %arg7[%c0_18, %c0_19] : memref<32x32xbf16, #tpu.memory_space<vmem>>, vector<32x32xbf16>
    %cst_20 = arith.constant dense<0.000000e+00> : vector<32x32xf32>
    %24 = tpu.matmul %22, %23, %cst_20 {dimension_numbers = #tpu.dot_dimension_numbers<[1], [0], [0], [1], [0, 0, 1, 1], [], []>} : vector<32x32xbf16>, vector<32x32xbf16>, vector<32x32xf32> -> vector<32x32xf32>
    %c0_21 = arith.constant 0 : index
    %c0_22 = arith.constant 0 : index
    %25 = vector.load %arg8[%c0_21, %c0_22] : memref<1x32xf32, #tpu.memory_space<vmem>>, vector<1x32xf32>
    %26 = vector.broadcast %25 : vector<1x32xf32> to vector<32x32xf32>
    %27 = arith.addf %24, %26 : vector<32x32xf32>
    %c0_23 = arith.constant 0 : index
    %c0_24 = arith.constant 0 : index
    %28 = vector.load %arg9[%c0_23, %c0_24] : memref<32x32xf32, #tpu.memory_space<vmem>>, vector<32x32xf32>
    tpu.vector_store %arg9[%c0_23, %c0_24], %27 {strides = array<i32>} : memref<32x32xf32, #tpu.memory_space<vmem>>, vector<32x32xf32>,
    return
  }
  func.func @transform_0(%arg0: i32) -> (i32, i32) {
    %c0_i32 = arith.constant 0 : i32
    %c0_i32_0 = arith.constant 0 : i32
    return %arg0, %c0_i32 : i32, i32
  }
  func.func @transform_1(%arg0: i32) -> (i32, i32, i32) {
    %c0_i32 = arith.constant 0 : i32
    %c0_i32_0 = arith.constant 0 : i32
    %c0_i32_1 = arith.constant 0 : i32
    return %c0_i32, %arg0, %c0_i32_0 : i32, i32, i32
  }
  func.func @transform_2(%arg0: i32) -> (i32, i32, i32) {
    %c0_i32 = arith.constant 0 : i32
    %c0_i32_0 = arith.constant 0 : i32
    %c0_i32_1 = arith.constant 0 : i32
    return %c0_i32, %arg0, %c0_i32_0 : i32, i32, i32
  }
  func.func @transform_3(%arg0: i32) -> (i32, i32) {
    %c0_i32 = arith.constant 0 : i32
    %c0_i32_0 = arith.constant 0 : i32
    %c0_i32_1 = arith.constant 0 : i32
    return %c0_i32, %c0_i32_0 : i32, i32
  }
  func.func @transform_4(%arg0: i32) -> (i32, i32) {
    %c0_i32 = arith.constant 0 : i32
    %c0_i32_0 = arith.constant 0 : i32
    %c0_i32_1 = arith.constant 0 : i32
    return %c0_i32, %c0_i32_0 : i32, i32
  }
  func.func @transform_5(%arg0: i32) -> (i32, i32) {
    %c0_i32 = arith.constant 0 : i32
    %c0_i32_0 = arith.constant 0 : i32
    %c0_i32_1 = arith.constant 0 : i32
    return %c0_i32, %c0_i32_0 : i32, i32
  }
  func.func @transform_6(%arg0: i32) -> (i32, i32) {
    %c0_i32 = arith.constant 0 : i32
    %c0_i32_0 = arith.constant 0 : i32
    %c0_i32_1 = arith.constant 0 : i32
    return %c0_i32, %c0_i32_0 : i32, i32
  }
  func.func @transform_7(%arg0: i32) -> (i32, i32) {
    %c0_i32 = arith.constant 0 : i32
    %c0_i32_0 = arith.constant 0 : i32
    %c0_i32_1 = arith.constant 0 : i32
    return %c0_i32, %c0_i32_0 : i32, i32
  }
  func.func @transform_8(%arg0: i32) -> (i32, i32) {
    %c0_i32 = arith.constant 0 : i32
    %c0_i32_0 = arith.constant 0 : i32
    return %arg0, %c0_i32 : i32, i32
  }
}

</mosaic_0001>

<bundles_post_ra>
// kernel: meta_layer_forward.3
= control target key start
LH: loop header
LB: loop body
LE: loop exit
PB: predicated region body
PF: predicated region fallthrough
CT: control target
= control target key end

     0   :  { %s1079_s27 = smov 0   ;;  %s1081_s28 = smov 0   ;;  %s1208_s0 = inlined_call_operand.vmem [shape: f32[64,32], index: 0, kind: input, shape index: {}]   ;;  %s1209_s1 = inlined_call_operand.vmem [shape: f32[2,64,32], index: 1, kind: input, shape index: {}]   ;;  %s1210_s2 = inlined_call_operand.vmem [shape: f32[2,64,1], index: 2, kind: input, shape index: {}]   ;;  %s1211_s3 = inlined_call_operand.vmem [shape: bf16[32,32], index: 3, kind: input, shape index: {}]   ;;  %s1212_s4 = inlined_call_operand.vmem [shape: bf16[32,32], index: 4, kind: input, shape index: {}]   ;;  %s1213_s5 = inlined_call_operand.vmem [shape: f32[1,32], index: 5, kind: input, shape index: {}]   ;;  %s1214_s6 = inlined_call_operand.vmem [shape: bf16[32,32], index: 6, kind: input, shape index: {}]   ;;  %s1215_s7 = inlined_call_operand.vmem [shape: f32[1,32], index: 7, kind: input, shape index: {}]   ;;  %s1216_s8 = inlined_call_operand.vmem [shape: f32[64,32], index: 8, kind: output, shape index: {}]  }
   0x1   :  { %s1083_s29 = smov 0  }
   0x2 LB: > { %s893_s30 = sadd.s32 4294967295, %s1031_s29   ;;  %s1096_s9 = sadd.s32 1, %s1031_s29   ;;  %s1031_s29 = sphi %s1083_s29, %s1220_s29   ;;  %s1027_s28 = sphi %s1081_s28, %s1219_s28   ;;  %s1023_s27 = sphi %s1079_s27, %s1218_s27  }
   0x3   : > { %s48_s10 = ssub.s32 %s1031_s29, %s1096_s9  ;;  %s51_s11 = sadd.s32 1, %s1027_s28 }
   0x4   : > { %p49_p0 = scmp.eq.s32.totalorder %s48_s10, 0  ;;  %p58_p1 = scmp.ne.s32.totalorder %s1027_s28, %s1023_s27 }
   0x5   : > { %p59_p2 = scmp.eq.s32.totalorder %s1031_s29, 0  ;;  %p896_p4 = scmp.ge.s32.totalorder %s1031_s29, 2 }
   0x6   : > { %s1105_s12 = scalar_select %p49_p0, %s1027_s28, %s51_s11  }
   0x7   : > { %p1107_p3 = por %p59_p2, %p58_p1  ;;  %256 = sbr.rel (%p896_p4) target bundleno = 30 (0x1e), region = 36 }
   0xe   : > { %268 = sbr.rel (!%p1107_p3) target bundleno = 22 (0x16), region = 44  ;;  %s270_s14 = sand.u32 (%p1107_p3), 1, %s1027_s28  }
   0xf   : > { %s926_s15 = sshll.u32 (%p1107_p3), %s1031_s29, 5  ;;  %s897_s16 = sshll.u32 (%p1107_p3), %s270_s14, 6 }
  0x10   : > { %s275_s19 = scalar_lea.vmem (%p1107_p3), %s1209_s1, %s926_s15  ;;  %s272_s20 = scalar_lea.vmem (%p1107_p3), [#allocation2], %s897_s16 }
  0x11   : > { %v317_v0 = vld [vmem:[%s275_s19] sm:$0xff] (%p1107_p3)  ;;  %v319_v1 = vld [vmem:[%s275_s19 + $0x8] sm:$0xff] (%p1107_p3)  ;;  %v321_v2 = vld [vmem:[%s275_s19 + $0x10] sm:$0xff] (%p1107_p3) }
  0x12   : > { %318 = vst [vmem:[%s272_s20] sm:$0xff] (%p1107_p3), %v317_v0  ;;  %320 = vst [vmem:[%s272_s20 + $0x8] sm:$0xff] (%p1107_p3), %v319_v1  ;;  %v323_v3 = vld [vmem:[%s275_s19 + $0x18] sm:$0xff] (%p1107_p3)  ;;  %v325_v4 = vld [vmem:[%s275_s19 + $0x40] sm:$0xff] (%p1107_p3) }
  0x13   : > { %322 = vst [vmem:[%s272_s20 + $0x10] sm:$0xff] (%p1107_p3), %v321_v2  ;;  %v327_v5 = vld [vmem:[%s275_s19 + $0x48] sm:$0xff] (%p1107_p3)  ;;  %324 = vst [vmem:[%s272_s20 + $0x18] sm:$0xff] (%p1107_p3), %v323_v3  ;;  %v329_v6 = vld [vmem:[%s275_s19 + $0x50] sm:$0xff] (%p1107_p3) }
  0x14   : > { %326 = vst [vmem:[%s272_s20 + $0x20] sm:$0xff] (%p1107_p3), %v325_v4  ;;  %328 = vst [vmem:[%s272_s20 + $0x28] sm:$0xff] (%p1107_p3), %v327_v5  ;;  %v331_v7 = vld [vmem:[%s275_s19 + $0x58] sm:$0xff] (%p1107_p3) }
  0x15   : > { %330 = vst [vmem:[%s272_s20 + $0x30] sm:$0xff] %v329_v6  ;;  %332 = vst [vmem:[%s272_s20 + $0x38] sm:$0xff] %v331_v7 }
  0x16 PF: > { %338 = sbr.rel (!%p1107_p3) target bundleno = 30 (0x1e), region = 82  ;;  %s340_s21 = sand.u32 (%p1107_p3), 1, %s1027_s28  }
  0x17   : > { %s927_s22 = sshll.u32 (%p1107_p3), %s1031_s29, 5  ;;  %s900_s23 = sshll.u32 (%p1107_p3), %s340_s21, 6 }
  0x18   : > { %s345_s26 = scalar_lea.vmem (%p1107_p3), %s1210_s2, %s927_s22  ;;  %s342_s10 = scalar_lea.vmem (%p1107_p3), [#allocation3], %s900_s23 }
  0x19   : > { %v387_v8 = vld [vmem:[%s345_s26] sm:$0xff] (%p1107_p3)  ;;  %v389_v9 = vld [vmem:[%s345_s26 + $0x8] sm:$0xff] (%p1107_p3)  ;;  %v391_v10 = vld [vmem:[%s345_s26 + $0x10] sm:$0xff] (%p1107_p3) }
  0x1a   : > { %388 = vst [vmem:[%s342_s10] sm:$0xff] (%p1107_p3), %v387_v8  ;;  %390 = vst [vmem:[%s342_s10 + $0x8] sm:$0xff] (%p1107_p3), %v389_v9  ;;  %v393_v11 = vld [vmem:[%s345_s26 + $0x18] sm:$0xff] (%p1107_p3)  ;;  %v395_v12 = vld [vmem:[%s345_s26 + $0x40] sm:$0xff] (%p1107_p3) }
  0x1b   : > { %392 = vst [vmem:[%s342_s10 + $0x10] sm:$0xff] (%p1107_p3), %v391_v10  ;;  %v397_v13 = vld [vmem:[%s345_s26 + $0x48] sm:$0xff] (%p1107_p3)  ;;  %394 = vst [vmem:[%s342_s10 + $0x18] sm:$0xff] (%p1107_p3), %v393_v11  ;;  %v399_v14 = vld [vmem:[%s345_s26 + $0x50] sm:$0xff] (%p1107_p3) }
  0x1c   : > { %396 = vst [vmem:[%s342_s10 + $0x20] sm:$0xff] (%p1107_p3), %v395_v12  ;;  %398 = vst [vmem:[%s342_s10 + $0x28] sm:$0xff] (%p1107_p3), %v397_v13  ;;  %v401_v15 = vld [vmem:[%s345_s26 + $0x58] sm:$0xff] (%p1107_p3) }
  0x1d   : > { %400 = vst [vmem:[%s342_s10 + $0x30] sm:$0xff] %v399_v14  ;;  %402 = vst [vmem:[%s342_s10 + $0x38] sm:$0xff] %v401_v15 }
  0x1e PF: > { %p903_p5 = scmp.ge.s32.totalorder %s1031_s29, 1  ;;  %p407_p6 = scmp.lt.s32.totalorder %s1031_s29, 3 }
  0x20   : > { %p408_p7 = pnand %p903_p5, %p407_p6 }
  0x21   : > { %s414_s11 = sand.u32 (!%p408_p7), 1, %s1023_s27   ;;  %v1033_v16 = vmov (!%p408_p7), 0   ;;  %vm507_vm0 = vcmask (!%p408_p7), 7168   ;;  %v995_v43 = vld [vmem:[%s1212_s4] sm:$0xff] (!%p408_p7)   ;;  %v996_v46 = vld [vmem:[%s1212_s4 + $0x8] sm:$0xff] (!%p408_p7)   ;;  %s906_s20 = sshll.u32 (!%p408_p7), %s893_s30, 2 }
  0x22   : > { %411 = sbr.rel (%p408_p7) target bundleno = 644 (0x284), region = 120  ;;  %994 = vset.pattern.permute.xlu1 (!%p408_p7), %v1033_v16  ;;  %993 = vset.pattern.permute.xlu0 (!%p408_p7), %v1033_v16  ;;  %s1129_s13 = sshll.u32 (!%p408_p7), %s414_s11, 6  ;;  %v997_v47 = vld [vmem:[%s1211_s3] sm:$0xff] (!%p408_p7)   ;;  %vm486_vm1 = vcmask (!%p408_p7), 261120  }
  0x23   : > { %s423_s14 = scalar_lea.vmem (!%p408_p7), [#allocation3], %s1129_s13  ;;  %940 = vmatprep.subr.bf16.mxu0 (!%p408_p7), %v995_v43  ;;  %p464_p8 = scmp.lt.s32.totalorder (!%p408_p7), %s906_s20, 7 }
  0x24   : > { %v501_v17 = vld [vmem:[%s423_s14 + $0x10] sm:$0xff] (!%p408_p7)  ;;  %v499_v19 = vld [vmem:[%s423_s14] sm:$0xff] (!%p408_p7)  ;;  %v502_v24 = vld [vmem:[%s423_s14 + $0x18] sm:$0xff] (!%p408_p7)  ;;  %941 = vmatpush3.bf16.msra.mxu0 (!%p408_p7), %v995_v43  ;;  %s416_s21 = scalar_lea.vmem (!%p408_p7), [#allocation2], %s1129_s13 }
  0x25   : > { %v505_v18 = vld [vmem:[%s423_s14 + $0x30] sm:$0xff] (!%p408_p7)  ;;  %v514_v20 = vsel (!%p408_p7), %vm507_vm0, %v501_v17, 0.0  ;;  %v503_v22 = vld [vmem:[%s423_s14 + $0x20] sm:$0xff] (!%p408_p7)  ;;  %v508_v23 = vsel (!%p408_p7), %vm507_vm0, %v499_v19, 0.0  ;;  %v506_v25 = vld [vmem:[%s423_s14 + $0x38] sm:$0xff] (!%p408_p7)  ;;  %v517_v28 = vsel (!%p408_p7), %vm507_vm0, %v502_v24, 0.0  ;;  %942 = vmatprep.subr.bf16.mxu0 (!%p408_p7), %v996_v46 }
  0x26   : > { %v515_v21 = vsel (!%p408_p7), %vm507_vm0, %v505_v18, 0.0  ;;  %v509_v27 = vsel (!%p408_p7), %vm507_vm0, %v503_v22, 0.0  ;;  %v518_v29 = vsel (!%p408_p7), %vm507_vm0, %v506_v25, 0.0  ;;  %v500_v30 = vld [vmem:[%s423_s14 + $0x8] sm:$0xff] (!%p408_p7)  ;;  %v480_v48 = vld [vmem:[%s416_s21 + $0x10] sm:$0xff] (!%p408_p7)  ;;  %v478_v49 = vld [vmem:[%s416_s21] sm:$0xff] (!%p408_p7) }
  0x27   : > { %v516_v26 = vadd.f32 (!%p408_p7), %v515_v21, %v514_v20  ;;  %v504_v31 = vld [vmem:[%s423_s14 + $0x28] sm:$0xff] (!%p408_p7)  ;;  %v510_v32 = vadd.f32 (!%p408_p7), %v509_v27, %v508_v23  ;;  %v519_v33 = vadd.f32 (!%p408_p7), %v518_v29, %v517_v28  ;;  %v511_v34 = vsel (!%p408_p7), %vm507_vm0, %v500_v30, 0.0  ;;  %v484_v50 = vld [vmem:[%s416_s21 + $0x30] sm:$0xff] (!%p408_p7)  ;;  %v481_v51 = vld [vmem:[%s416_s21 + $0x18] sm:$0xff] (!%p408_p7) }
  0x28   : > { %v512_v35 = vsel (!%p408_p7), %vm507_vm0, %v504_v31, 0.0  ;;  %943 = vmatpush3.bf16.msra.mxu0 (!%p408_p7), %v996_v46  ;;  %v485_v52 = vld [vmem:[%s416_s21 + $0x38] sm:$0xff] (!%p408_p7)  ;;  %v482_v53 = vld [vmem:[%s416_s21 + $0x20] sm:$0xff] (!%p408_p7)  ;;  %v479_v54 = vld [vmem:[%s416_s21 + $0x8] sm:$0xff] (!%p408_p7)  ;;  %v493_v56 = vsel (!%p408_p7), %vm486_vm1, %v480_v48, 0.0  ;;  %v494_v57 = vsel (!%p408_p7), %vm486_vm1, %v484_v50, 0.0 }
  0x29   : > { %v522_v36 = vmax.f32 %v516_v26, 1.0  ;;  %v513_v37 = vadd.f32 %v512_v35, %v511_v34  ;;  %v520_v38 = vmax.f32 %v510_v32, 1.0  ;;  %v523_v39 = vmax.f32 %v519_v33, 1.0  ;;  %948 = vmatprep.subr.bf16.mxu0 %v997_v47  ;;  %s1222_s20 = smov (!%p464_p8, %s906_s20), 7  ;;  %v483_v55 = vld [vmem:[%s416_s21 + $0x28] sm:$0xff]  ;;  %v999_v21 = vld [vmem:[%s1214_s6] sm:$0xff]  }
  0x2a   : > { %v496_v58 = vsel %vm486_vm1, %v481_v51, 0.0  ;;  %v497_v59 = vsel %vm486_vm1, %v485_v52, 0.0  ;;  %v487_v60 = vsel %vm486_vm1, %v478_v49, 0.0  ;;  %v488_v61 = vsel %vm486_vm1, %v482_v53, 0.0  ;;  %s907_s29 = sshll.u32 %s1222_s20, 3  ;;  %v998_v17 = vld [vmem:[%s1211_s3 + $0x8] sm:$0xff]   ;;  %956 = vmatprep.subr.bf16.mxu1 %v999_v21 }
  0x2b   : > { %1001 = vrcp.f32 %v522_v36  ;;  %v521_v40 = vmax.f32 %v513_v37, 1.0  ;;  %v490_v62 = vsel %vm486_vm1, %v479_v54, 0.0  ;;  %v491_v63 = vsel %vm486_vm1, %v483_v55, 0.0  ;;  %s467_s23 = scalar_lea.vmem %s1208_s0, %s907_s29  ;;  %957 = vmatpush3.bf16.msra.mxu1 %v999_v21  ;;  %v1000_v22 = vld [vmem:[%s1214_s6 + $0x8] sm:$0xff]   ;;  %v918_v23 = vld [vmem:[%s1213_s5] ss:$0 sm:$0xff]  ;;  %s475_s19 = scalar_lea.vmem %s1216_s8, %s907_s29 }
  0x2c   : > { %1003 = vrcp.f32 %v520_v38  ;;  %v495_v1 = vadd.f32 %v494_v57, %v493_v56  ;;  %v498_v3 = vadd.f32 %v497_v59, %v496_v58  ;;  %v489_v4 = vadd.f32 %v488_v61, %v487_v60  ;;  %v552_v10 = vld [vmem:[%s467_s23] sm:$0xff]  ;;  %v553_v11 = vld [vmem:[%s467_s23 + $0x8] sm:$0xff]  ;;  %v554_v18 = vld [vmem:[%s467_s23 + $0x10] sm:$0xff]  ;;  %958 = vmatprep.subr.bf16.mxu1 %v1000_v22 }
  0x2d   : > { %1005 = vrcp.f32 %v523_v39  ;;  %v492_v5 = vadd.f32 %v491_v63, %v490_v62  ;;  %v556_v16 = vpack.c.bf16 %v553_v11, %v552_v10  ;;  %v555_v19 = vld [vmem:[%s467_s23 + $0x18] sm:$0xff]  ;;  %v919_v38 = vld [vmem:[%s1215_s7] ss:$0 sm:$0xff] }
  0x2e   : > { %1007 = vrcp.f32 %v521_v40  ;;  %v557_v20 = vpack.c.bf16 %v555_v19, %v554_v18 }
  0x2f   : > { %959 = vmatpush3.bf16.msra.mxu1 %v1000_v22 }
  0x35   : > { %v1002_v41 = vpop.eup %1001 }
  0x36   : > { %v1004_v42 = vpop.eup %1003  ;;  %540 = vperm.xlu1 %994, %v1002_v41  }
  0x37   : > { %v1006_v44 = vpop.eup %1005  ;;  %530 = vperm.xlu0 %993, %v1004_v42  }
  0x38   : > { %v1008_v45 = vpop.eup %1007 }
  0x3a   : > { %545 = vperm.xlu1 %994, %v1006_v44  }
  0x3b   : > { %535 = vperm.xlu0 %993, %v1008_v45  }
  0xb5   : > { %v541_v0 = vpop.permute.xlu1 %540 }
  0xb6   : > { %v531_v2 = vpop.permute.xlu0 %530  ;;  %v550_v7 = vmul.f32 %v541_v0, %v495_v1 }
  0xb7   : > { %v548_v12 = vmul.f32 %v531_v2, %v489_v4 }
  0xb9   : > { %v546_v6 = vpop.permute.xlu1 %545 }
  0xba   : > { %v551_v8 = vmul.f32 %v546_v6, %v498_v3  ;;  %v536_v9 = vpop.permute.xlu0 %535 }
  0xbb   : > { %v549_v13 = vmul.f32 %v536_v9, %v492_v5 }
  0xbc   : > { %v563_v14 = vpack.c.bf16 %v551_v8, %v550_v7 }
  0xbd   : > { %v562_v15 = vpack.c.bf16 %v549_v13, %v548_v12 }
  0xbf   : > { %944 = vmatprep.mubr.msk.bf16.mxu0 %vm486_vm1, %v562_v15 }
  0xc0   : > { %945 = vmatmul.mubr.msk.bf16.vlgmr.msra.gmra.mrb[0].mxu0 %vm486_vm1, %v563_v14 }
  0xc1   : > { %949 = vmatpush3.bf16.msra.mxu0 %v997_v47  ;;  %952 = vmatprep.mubr.msk.bf16.mxu0 %vm486_vm1, %v556_v16 }
  0xc2   : > { %950 = vmatprep.subr.bf16.mxu0 %v998_v17 }
  0xc5   : > { %951 = vmatpush3.bf16.msra.mxu0 %v998_v17 }
  0xcc   : > { %953 = vmatmul.mubr.msk.bf16.vlgmr.msra.gmra.mrb[0].mxu0 %vm486_vm1, %v557_v20 }
 0x19f   : > { %v954_v24 = vpop.f32.mrb[0].mxu0 }
 0x1a0   : > { %v711_v25 = vadd.f32 %v954_v24, %v918_v23  ;;  %v687_v26 = vpop.f32.mrb[1].mxu0 }
 0x1a1   : > { %v709_v27 = vadd.f32 %v918_v23, %v687_v26  ;;  %v955_v28 = vpop.f32.mrb[2].mxu0 }
 0x1a2   : > { %v712_v29 = vadd.f32 %v955_v28, %v918_v23  ;;  %v690_v30 = vpop.f32.mrb[3].mxu0  ;;  %v715_v32 = vmax.f32 %v711_v25, 0.0 }
 0x1a3   : > { %v710_v31 = vadd.f32 %v918_v23, %v690_v30  ;;  %v713_v34 = vmax.f32 %v709_v27, 0.0 }
 0x1a4   : > { %v716_v33 = vmax.f32 %v712_v29, 0.0 }
 0x1a5   : > { %v714_v35 = vmax.f32 %v710_v31, 0.0 }
 0x1a6   : > { %v718_v36 = vpack.c.bf16 %v716_v33, %v715_v32 }
 0x1a7   : > { %v717_v37 = vpack.c.bf16 %v714_v35, %v713_v34 }
 0x1a9   : > { %960 = vmatprep.mubr.msk.bf16.mxu1 %vm486_vm1, %v717_v37 }
 0x1aa   : > { %961 = vmatmul.mubr.msk.bf16.vlgmr.msra.gmra.mrb[0].mxu1 %vm486_vm1, %v718_v36 }
 0x27d   : > { %v962_v39 = vpop.f32.mrb[0].mxu1 }
 0x27e   : > { %v782_v40 = vpop.f32.mrb[1].mxu1  ;;  %v791_v45 = vadd.f32 %v962_v39, %v919_v38 }
 0x27f   : > { %v783_v41 = vadd.f32 %v919_v38, %v782_v40  ;;  %v963_v42 = vpop.f32.mrb[2].mxu1 }
 0x280   : > { %v785_v43 = vpop.f32.mrb[3].mxu1  ;;  %v794_v46 = vadd.f32 %v963_v42, %v919_v38  ;;  %799 = vst.msk [vmem:[%s475_s19 + $0x10] sm:$0xff] %vm486_vm1, %v791_v45 }
 0x281   : > { %797 = vst.msk [vmem:[%s475_s19] sm:$0xff] %vm486_vm1, %v783_v41  ;;  %v786_v44 = vadd.f32 %v919_v38, %v785_v43 }
 0x282   : > { %800 = vst.msk [vmem:[%s475_s19 + $0x18] sm:$0xff] %vm486_vm1, %v794_v46 }
 0x283   : > { %798 = vst.msk [vmem:[%s475_s19 + $0x8] sm:$0xff] %vm486_vm1, %v786_v44 }
 0x284 PF: > { %p15_p9 = scmp.ge.s32.totalorder %s1096_s9, 4   ;;  %s1218_s27 = smov %s1027_s28 }
 0x285   : > { %s1219_s28 = smov %s1105_s12  ;;  %s1220_s29 = smov %s1096_s9 }
 0x286   :  { %17 = sbr.rel (!%p15_p9) target bundleno = 2 (0x2), region = 174 }

// kernel: meta_layer_forward.2
= control target key start
LH: loop header
LB: loop body
LE: loop exit
PB: predicated region body
PF: predicated region fallthrough
CT: control target
= control target key end

     0   :  { %s2531_s18 = smov 0   ;;  %s2533_s19 = smov 0   ;;  %s2927_s0 = inlined_call_operand.vmem [shape: f32[512,32], index: 0, kind: input, shape index: {}]   ;;  %s2928_s1 = inlined_call_operand.vmem [shape: f32[512,32], index: 1, kind: input, shape index: {}]   ;;  %s2929_s2 = inlined_call_operand.vmem [shape: f32[512,16], index: 2, kind: input, shape index: {}]   ;;  %s2930_s3 = inlined_call_operand.vmem [shape: s32[1,512], index: 3, kind: input, shape index: {}]   ;;  %s2931_s4 = inlined_call_operand.vmem [shape: bf16[32,32], index: 4, kind: input, shape index: {}]   ;;  %s2932_s5 = inlined_call_operand.vmem [shape: bf16[32,32], index: 5, kind: input, shape index: {}]   ;;  %s2933_s6 = inlined_call_operand.vmem [shape: bf16[16,32], index: 6, kind: input, shape index: {}]   ;;  %s2934_s7 = inlined_call_operand.vmem [shape: f32[1,32], index: 7, kind: input, shape index: {}]   ;;  %s2935_s8 = inlined_call_operand.vmem [shape: bf16[32,16], index: 8, kind: input, shape index: {}]   ;;  %s2936_s9 = inlined_call_operand.vmem [shape: f32[1,16], index: 9, kind: input, shape index: {}]   ;;  %s2937_s10 = inlined_call_operand.vmem [shape: bf16[32,32], index: 10, kind: input, shape index: {}]   ;;  %s2938_s11 = inlined_call_operand.vmem [shape: bf16[16,32], index: 11, kind: input, shape index: {}]   ;;  %s2939_s12 = inlined_call_operand.vmem [shape: f32[1,32], index: 12, kind: input, shape index: {}]   ;;  %s2940_s13 = inlined_call_operand.vmem [shape: f32[512,16], index: 13, kind: output, shape index: {0}]   ;;  %s2941_s14 = inlined_call_operand.vmem [shape: f32[128,32], index: 14, kind: output, shape index: {1}]   ;;  %s2942_s15 = inlined_call_operand.vmem [shape: f32[128,1], index: 15, kind: output, shape index: {2}]  }
   0x1   :  { %2947 = sst [smem:[#allocation7_spill]] %s2927_s0  ;;  %s2535_s20 = smov 0  }
   0x2   :  { %2948 = sst [smem:[#allocation8_spill]] %s2936_s9  ;;  %s2537_s21 = smov 0  }
   0x3   :  { %2949 = sst [smem:[#allocation9_spill]] %s2937_s10  ;;  %s2539_s22 = smov 0  }
   0x4   :  { %2950 = sst [smem:[#allocation10_spill]] %s2939_s12 }
   0x5 LB: > { %2951 = sst [smem:[#allocation2_spill]] %s2434_s20  ;;  %s35_s23 = sadd.s32 1, %s2434_s20  ;;  %s2442_s22 = sphi %s2539_s22, %s26_s22   ;;  %s2438_s21 = sphi %s2537_s21, %s2966_s21   ;;  %s2434_s20 = sphi %s2535_s20, %s2965_s20   ;;  %s2430_s19 = sphi %s2533_s19, %s2964_s19   ;;  %s2426_s18 = sphi %s2531_s18, %s2963_s18  }
   0x6   : > { %2952 = sst [smem:[#allocation3_spill]] %s2438_s21  ;;  %s38_s24 = sadd.s32 1, %s2438_s21 }
   0x7   : > { %2953 = sst [smem:[#allocation4_spill]] %s2442_s22  ;;  %p36_p0 = scmp.ge.s32.totalorder %s35_s23, 2 }
   0x8   : > { %p1996_p1 = scmp.ge.s32.totalorder %s2442_s22, 1  ;;  %p521_p2 = scmp.lt.s32.totalorder %s2442_s22, 5 }
   0x9   : > { %s2968_s23 = smov (%p36_p0, %s35_s23), 0  ;;  %s2970_s24 = smov (!%p36_p0, %s38_s24), %s2438_s21 }
   0xa   : > { %2954 = sst [smem:[#allocation5_spill]] %s2968_s23  ;;  %p522_p3 = pnand %p1996_p1, %p521_p2 }
   0xb   : > { %p40_p4 = scmp.ge.s32.totalorder %s2970_s24, 2  ;;  %s1997_s25 = sshll.u32 (!%p522_p3), %s2430_s19, 1 }
   0xc   : > { %525 = sbr.rel (%p522_p3) target bundleno = 1074 (0x432), region = 72  ;;  %s603_s26 = sadd.s32 (!%p522_p3), %s2426_s18, %s1997_s25 }
   0xd   : > { %s2972_s24 = smov (%p40_p4, %s2970_s24), 0  ;;  %s1998_s27 = sshll.u32 (!%p522_p3), %s603_s26, 4 }
   0xe   : > { %2955 = sst [smem:[#allocation6_spill]] %s2972_s24  ;;  %p634_p5 = scmp.lt.s32.totalorder (!%p522_p3), %s603_s26, 3 }
   0xf   : > { %p605_p6 = scmp.lt.s32.totalorder (!%p522_p3), %s1998_s27, 63  ;;  %s2010_s28 = sshll.u32 (!%p522_p3), %s2430_s19, 3 }
  0x10   : > { %p650_p7 = scmp.lt.s32.totalorder (!%p522_p3), %s2010_s28, 15  ;;  %s2956_s0 = sld [smem:[#allocation7_spill]] (!%p522_p3) }
  0x11   : > { %p2014_p8 = scmp.ne.s32.totalorder (!%p522_p3), %s2426_s18, 0 }
  0x13   : > { %s2974_s26 = smov (!%p634_p5, %s603_s26), 3  ;;  %s2976_s27 = smov (!%p605_p6, %s1998_s27), 63 }
  0x14   : > { %s1999_s17 = sshll.u32 %s2976_s27, 3  ;;  %s2978_s28 = smov (!%p650_p7, %s2010_s28), 15  ;;  %vm666_vm0 = vcmask (!%p2014_p8), 261120   ;;  %vm675_vm1 = vcmask (!%p2014_p8), 7168   ;;  %v2448_v0 = vmov (!%p2014_p8), 0.0  }
  0x15   : > { %s2582_s22 = scalar_lea.vmem %s2928_s1, %s1999_s17  ;;  %s2587_s9 = scalar_lea.vmem %s2929_s2, %s1999_s17 }
  0x16   : > { %s2577_s21 = scalar_lea.vmem %s2956_s0, %s1999_s17  ;;  %s2592_s30 = scalar_lea.vmem %s2940_s13, %s1999_s17 }
  0x17   : > { %s2011_s27 = sshll.u32 %s2978_s28, 3  ;;  %665 = sbr.rel (%p2014_p8) target bundleno = 33 (0x21), region = 76 }
  0x18   : > { %s2597_s16 = scalar_lea.vmem %s2941_s14, %s2011_s27  ;;  %s2602_s0 = scalar_lea.vmem %s2942_s15, %s2011_s27 }
  0x19   : > { %667 = vst.msk [vmem:[%s2597_s16] sm:$0xff] (!%p2014_p8), %vm666_vm0, %v2448_v0  ;;  %668 = vst.msk [vmem:[%s2597_s16 + $0x8] sm:$0xff] (!%p2014_p8), %vm666_vm0, %v2448_v0 }
  0x1a   : > { %669 = vst.msk [vmem:[%s2597_s16 + $0x10] sm:$0xff] (!%p2014_p8), %vm666_vm0, %v2448_v0  ;;  %670 = vst.msk [vmem:[%s2597_s16 + $0x18] sm:$0xff] (!%p2014_p8), %vm666_vm0, %v2448_v0 }
  0x1b   : > { %671 = vst.msk [vmem:[%s2597_s16 + $0x20] sm:$0xff] (!%p2014_p8), %vm666_vm0, %v2448_v0  ;;  %672 = vst.msk [vmem:[%s2597_s16 + $0x28] sm:$0xff] (!%p2014_p8), %vm666_vm0, %v2448_v0 }
  0x1c   : > { %673 = vst.msk [vmem:[%s2597_s16 + $0x30] sm:$0xff] (!%p2014_p8), %vm666_vm0, %v2448_v0  ;;  %674 = vst.msk [vmem:[%s2597_s16 + $0x38] sm:$0xff] (!%p2014_p8), %vm666_vm0, %v2448_v0 }
  0x1d   : > { %676 = vst.msk [vmem:[%s2602_s0] sm:$0xff] (!%p2014_p8), %vm675_vm1, %v2448_v0  ;;  %677 = vst.msk [vmem:[%s2602_s0 + $0x8] sm:$0xff] (!%p2014_p8), %vm675_vm1, %v2448_v0 }
  0x1e   : > { %678 = vst.msk [vmem:[%s2602_s0 + $0x10] sm:$0xff] %vm675_vm1, %v2448_v0  ;;  %679 = vst.msk [vmem:[%s2602_s0 + $0x18] sm:$0xff] %vm675_vm1, %v2448_v0 }
  0x1f   : > { %680 = vst.msk [vmem:[%s2602_s0 + $0x20] sm:$0xff] %vm675_vm1, %v2448_v0  ;;  %681 = vst.msk [vmem:[%s2602_s0 + $0x28] sm:$0xff] %vm675_vm1, %v2448_v0 }
  0x20   : > { %682 = vst.msk [vmem:[%s2602_s0 + $0x30] sm:$0xff] %vm675_vm1, %v2448_v0  ;;  %683 = vst.msk [vmem:[%s2602_s0 + $0x38] sm:$0xff] %vm675_vm1, %v2448_v0 }
  0x21 PF: > { %v2390_v1 = vld [vmem:[%s2932_s5] sm:$0xff]   ;;  %v2391_v2 = vld [vmem:[%s2932_s5 + $0x8] sm:$0xff]   ;;  %vm776_vm2 = vcmask 261120   ;;  %v710_v5 = vld [vmem:[%s2582_s22 + $0x10] sm:$0xff]  ;;  %vm1039_vm3 = vcmask 130048   ;;  %s2957_s19 = sld [smem:[#allocation9_spill]]  ;;  %s2960_s25 = scalar_lea.vmem %s2930_s3, %s2974_s26 }
  0x22   : > { %2155 = vmatprep.subr.bf16.mxu0 %v2390_v1  ;;  %v708_v3 = vld [vmem:[%s2582_s22] sm:$0xff]  ;;  %v709_v4 = vld [vmem:[%s2582_s22 + $0x8] sm:$0xff]  ;;  %v711_v7 = vld [vmem:[%s2582_s22 + $0x18] sm:$0xff]  ;;  %s2959_s24 = sld [smem:[#allocation8_spill]]  ;;  %s2862_s26 = smov 0  }
  0x23   : > { %2156 = vmatpush3.bf16.msra.mxu0 %v2390_v1  ;;  %v724_v6 = vpack.c.bf16 %v709_v4, %v708_v3  ;;  %v2392_v8 = vld [vmem:[%s2931_s4] sm:$0xff]   ;;  %v713_v10 = vld [vmem:[%s2582_s22 + $0x28] sm:$0xff]  ;;  %v725_v11 = vpack.c.bf16 %v711_v7, %v710_v5  ;;  %v714_v14 = vld [vmem:[%s2582_s22 + $0x30] sm:$0xff] }
  0x24   : > { %2157 = vmatprep.subr.bf16.mxu0 %v2391_v2  ;;  %v712_v9 = vld [vmem:[%s2582_s22 + $0x20] sm:$0xff]  ;;  %v2393_v13 = vld [vmem:[%s2931_s4 + $0x8] sm:$0xff]   ;;  %v715_v15 = vld [vmem:[%s2582_s22 + $0x38] sm:$0xff] }
  0x25   : > { %2159 = vmatprep.mubr.msk.bf16.mxu0 %vm776_vm2, %v724_v6  ;;  %v726_v12 = vpack.c.bf16 %v713_v10, %v712_v9  ;;  %v716_v16 = vld [vmem:[%s2582_s22 + $0x40] sm:$0xff]  ;;  %v717_v17 = vld [vmem:[%s2582_s22 + $0x48] sm:$0xff]  ;;  %v727_v19 = vpack.c.bf16 %v715_v15, %v714_v14  ;;  %v718_v21 = vld [vmem:[%s2582_s22 + $0x50] sm:$0xff] }
  0x26   : > { %v2394_v18 = vld [vmem:[%s2933_s6] sm:$0xff]   ;;  %v728_v20 = vpack.c.bf16 %v717_v17, %v716_v16  ;;  %v719_v22 = vld [vmem:[%s2582_s22 + $0x58] sm:$0xff]  ;;  %v721_v24 = vld [vmem:[%s2582_s22 + $0x68] sm:$0xff] }
  0x27   : > { %2158 = vmatpush3.bf16.msra.mxu0 %v2391_v2  ;;  %v720_v23 = vld [vmem:[%s2582_s22 + $0x60] sm:$0xff]  ;;  %v729_v25 = vpack.c.bf16 %v719_v22, %v718_v21  ;;  %v722_v27 = vld [vmem:[%s2582_s22 + $0x70] sm:$0xff]  ;;  %v723_v28 = vld [vmem:[%s2582_s22 + $0x78] sm:$0xff]  ;;  %s2958_s29 = smov %s2957_s19 }
  0x28   : > { %2175 = vmatprep.subr.bf16.mxu0 %v2392_v8  ;;  %v730_v26 = vpack.c.bf16 %v721_v24, %v720_v23  ;;  %v684_v29 = vld [vmem:[%s2577_s21] sm:$0xff]  ;;  %v685_v30 = vld [vmem:[%s2577_s21 + $0x8] sm:$0xff]  ;;  %v731_v31 = vpack.c.bf16 %v723_v28, %v722_v27  ;;  %v686_v33 = vld [vmem:[%s2577_s21 + $0x10] sm:$0xff] }
  0x29   : > { %v2669_v32 = vpack.c.bf16 %v685_v30, %v684_v29  ;;  %v687_v34 = vld [vmem:[%s2577_s21 + $0x18] sm:$0xff]  ;;  %v688_v35 = vld [vmem:[%s2577_s21 + $0x20] sm:$0xff]  ;;  %v689_v36 = vld [vmem:[%s2577_s21 + $0x28] sm:$0xff] }
  0x2a   : > { %2160 = vmatmul.mubr.msk.bf16.vlgmr.msra.gmra.mrb[0].mxu0 %vm776_vm2, %v725_v11  ;;  %v2678_v37 = vpack.c.bf16 %v687_v34, %v686_v33  ;;  %v2680_v38 = vpack.c.bf16 %v689_v36, %v688_v35  ;;  %v690_v39 = vld [vmem:[%s2577_s21 + $0x30] sm:$0xff]  ;;  %v691_v40 = vld [vmem:[%s2577_s21 + $0x38] sm:$0xff]  ;;  %v692_v41 = vld [vmem:[%s2577_s21 + $0x40] sm:$0xff] }
  0x2b   : > { %2176 = vmatpush3.bf16.msra.mxu0 %v2392_v8  ;;  %2163 = vmatprep.mubr.msk.bf16.mxu0 %vm776_vm2, %v726_v12  ;;  %v693_v42 = vld [vmem:[%s2577_s21 + $0x48] sm:$0xff]  ;;  %v2690_v43 = vpack.c.bf16 %v691_v40, %v690_v39  ;;  %v694_v45 = vld [vmem:[%s2577_s21 + $0x50] sm:$0xff]  ;;  %v695_v46 = vld [vmem:[%s2577_s21 + $0x58] sm:$0xff] }
  0x2c   : > { %2177 = vmatprep.subr.bf16.mxu0 %v2393_v13  ;;  %v2692_v44 = vpack.c.bf16 %v693_v42, %v692_v41  ;;  %v696_v47 = vld [vmem:[%s2577_s21 + $0x60] sm:$0xff]  ;;  %v697_v48 = vld [vmem:[%s2577_s21 + $0x68] sm:$0xff]  ;;  %v2702_v49 = vpack.c.bf16 %v695_v46, %v694_v45  ;;  %v698_v51 = vld [vmem:[%s2577_s21 + $0x70] sm:$0xff] }
  0x2d   : > { %v2704_v50 = vpack.c.bf16 %v697_v48, %v696_v47  ;;  %v699_v52 = vld [vmem:[%s2577_s21 + $0x78] sm:$0xff]  ;;  %v732_v53 = vld [vmem:[%s2587_s9] sm:$0xff]  ;;  %v733_v54 = vld [vmem:[%s2587_s9 + $0x8] sm:$0xff] }
  0x2e   : > { %v2714_v55 = vpack.c.bf16 %v699_v52, %v698_v51  ;;  %v748_v56 = vpack.c.bf16 %v733_v54, %v732_v53  ;;  %v734_v57 = vld [vmem:[%s2587_s9 + $0x10] sm:$0xff]  ;;  %v735_v58 = vld [vmem:[%s2587_s9 + $0x18] sm:$0xff]  ;;  %v736_v59 = vld [vmem:[%s2587_s9 + $0x20] sm:$0xff] }
  0x2f   : > { %2178 = vmatpush3.bf16.msra.mxu0 %v2393_v13  ;;  %v737_v60 = vld [vmem:[%s2587_s9 + $0x28] sm:$0xff]  ;;  %v749_v61 = vpack.c.bf16 %v735_v58, %v734_v57  ;;  %v738_v63 = vld [vmem:[%s2587_s9 + $0x30] sm:$0xff]  ;;  %v739_v0 = vld [vmem:[%s2587_s9 + $0x38] sm:$0xff] }
  0x30   : > { %2195 = vmatprep.subr.bf16.mxu0 %v2394_v18  ;;  %v750_v62 = vpack.c.bf16 %v737_v60, %v736_v59  ;;  %v740_v1 = vld [vmem:[%s2587_s9 + $0x40] sm:$0xff]  ;;  %v741_v2 = vld [vmem:[%s2587_s9 + $0x48] sm:$0xff]  ;;  %v751_v3 = vpack.c.bf16 %v739_v0, %v738_v63  ;;  %v742_v5 = vld [vmem:[%s2587_s9 + $0x50] sm:$0xff] }
  0x31   : > { %v752_v4 = vpack.c.bf16 %v741_v2, %v740_v1  ;;  %v743_v6 = vld [vmem:[%s2587_s9 + $0x58] sm:$0xff]  ;;  %v744_v7 = vld [vmem:[%s2587_s9 + $0x60] sm:$0xff]  ;;  %v745_v8 = vld [vmem:[%s2587_s9 + $0x68] sm:$0xff] }
  0x32   : > { %2164 = vmatmul.mubr.msk.bf16.gmra.mrb[4].mxu0 %vm776_vm2, %v727_v19  ;;  %v753_v9 = vpack.c.bf16 %v743_v6, %v742_v5  ;;  %v754_v10 = vpack.c.bf16 %v745_v8, %v744_v7  ;;  %v746_v11 = vld [vmem:[%s2587_s9 + $0x70] sm:$0xff]  ;;  %v747_v12 = vld [vmem:[%s2587_s9 + $0x78] sm:$0xff]  ;;  %v2395_v14 = vld [vmem:[%s2935_s8] sm:$0xff]   ;;  %s2961_s9 = sld [smem:[#allocation10_spill]] }
  0x33   : > { %2167 = vmatprep.mubr.msk.bf16.mxu0 %vm776_vm2, %v728_v20  ;;  %v755_v13 = vpack.c.bf16 %v747_v12, %v746_v11  ;;  %2213 = vmatprep.subr.bf16.mxu1 %v2395_v14  ;;  %v2396_v15 = vld [vmem:[%s2935_s8 + $0x8] sm:$0xff]   ;;  %v2397_v16 = vld [vmem:[%s2938_s11] sm:$0xff]  }
  0x34   : > { %2214 = vmatpush3.bf16.msra.mxu1 %v2395_v14  ;;  %v2044_v17 = vld [vmem:[%s2934_s7] ss:$0 sm:$0xff] }
  0x35   : > { %2215 = vmatprep.subr.bf16.mxu1 %v2396_v15 }
  0x38   : > { %2216 = vmatpush3.bf16.msra.mxu1 %v2396_v15 }
  0x39   : > { %2233 = vmatprep.subr.bf16.mxu1 %v2397_v16 }
  0x3a   : > { %2168 = vmatmul.mubr.msk.bf16.gmra.mrb[8].mxu0 %vm776_vm2, %v729_v25 }
  0x3b   : > { %2171 = vmatprep.mubr.msk.bf16.mxu0 %vm776_vm2, %v730_v26 }
  0x42   : > { %2172 = vmatmul.mubr.msk.bf16.gmra.mrb[12].mxu0 %vm776_vm2, %v731_v31 }
  0x43   : > { %2179 = vmatprep.mubr.msk.bf16.mxu0 %vm776_vm2, %v2669_v32 }
  0x4a   : > { %2180 = vmatmul.mubr.msk.bf16.vlgmr.msra.gmra.mrb[0].mxu0 %vm776_vm2, %v2678_v37 }
  0x4b   : > { %2196 = vmatpush3.bf16.msra.mxu0 %v2394_v18  ;;  %2183 = vmatprep.mubr.msk.bf16.mxu0 %vm776_vm2, %v2680_v38 }
  0x52   : > { %2184 = vmatmul.mubr.msk.bf16.gmra.mrb[4].mxu0 %vm776_vm2, %v2690_v43 }
  0x53   : > { %2187 = vmatprep.mubr.msk.bf16.mxu0 %vm776_vm2, %v2692_v44 }
  0x5a   : > { %2188 = vmatmul.mubr.msk.bf16.gmra.mrb[8].mxu0 %vm776_vm2, %v2702_v49 }
  0x5b   : > { %2191 = vmatprep.mubr.msk.bf16.mxu0 %vm776_vm2, %v2704_v50 }
  0x62   : > { %2192 = vmatmul.mubr.msk.bf16.gmra.mrb[12].mxu0 %vm776_vm2, %v2714_v55 }
  0x63   : > { %2197 = vmatprep.mubr.msk.bf16.mxu0 %vm1039_vm3, %v748_v56 }
  0x6a   : > { %2198 = vmatmul.mubr.msk.bf16.vlgmr.msra.gmra.mrb[0].mxu0 %vm1039_vm3, %v749_v61 }
  0x6b   : > { %2201 = vmatprep.mubr.msk.bf16.mxu0 %vm1039_vm3, %v750_v62 }
  0x72   : > { %2202 = vmatmul.mubr.msk.bf16.gmra.mrb[4].mxu0 %vm1039_vm3, %v751_v3 }
  0x73   : > { %2205 = vmatprep.mubr.msk.bf16.mxu0 %vm1039_vm3, %v752_v4 }
  0x7a   : > { %2206 = vmatmul.mubr.msk.bf16.gmra.mrb[8].mxu0 %vm1039_vm3, %v753_v9 }
  0x7b   : > { %2209 = vmatprep.mubr.msk.bf16.mxu0 %vm1039_vm3, %v754_v10 }
  0x82   : > { %2210 = vmatmul.mubr.msk.bf16.gmra.mrb[12].mxu0 %vm1039_vm3, %v755_v13 }
 0x13d   : > { %v2199_v18 = vpop.f32.mrb[0].mxu0 }
 0x13e   : > { %v1186_v19 = vadd.f32 %v2199_v18, %v2044_v17  ;;  %v1098_v20 = vpop.f32.mrb[1].mxu0 }
 0x13f   : > { %v1184_v21 = vadd.f32 %v2044_v17, %v1098_v20  ;;  %v2200_v22 = vpop.f32.mrb[2].mxu0 }
 0x140   : > { %v1187_v23 = vadd.f32 %v2200_v22, %v2044_v17  ;;  %v1101_v24 = vpop.f32.mrb[3].mxu0  ;;  %v1202_v26 = vmax.f32 %v1186_v19, 0.0  ;;  %v2398_v19 = vld [vmem:[%s2957_s19] sm:$0xff]  }
 0x141   : > { %v1185_v25 = vadd.f32 %v2044_v17, %v1101_v24  ;;  %v1200_v28 = vmax.f32 %v1184_v21, 0.0 }
 0x142   : > { %v1203_v27 = vmax.f32 %v1187_v23, 0.0 }
 0x143   : > { %v1201_v29 = vmax.f32 %v1185_v25, 0.0 }
 0x144   : > { %v1217_v30 = vpack.c.bf16 %v1203_v27, %v1202_v26 }
 0x145   : > { %v2203_v31 = vpop.f32.mrb[4].mxu0  ;;  %v1216_v33 = vpack.c.bf16 %v1201_v29, %v1200_v28 }
 0x146   : > { %v1190_v34 = vadd.f32 %v2203_v31, %v2044_v17  ;;  %v1114_v35 = vpop.f32.mrb[5].mxu0 }
 0x147   : > { %v1188_v36 = vadd.f32 %v2044_v17, %v1114_v35  ;;  %v2204_v39 = vpop.f32.mrb[6].mxu0  ;;  %2217 = vmatprep.mubr.msk.bf16.mxu1 %vm776_vm2, %v1216_v33 }
 0x148   : > { %v1191_v40 = vadd.f32 %v2204_v39, %v2044_v17  ;;  %v1117_v41 = vpop.f32.mrb[7].mxu0  ;;  %2218 = vmatmul.mubr.msk.bf16.vlgmr.msra.gmra.mrb[0].mxu1 %vm776_vm2, %v1217_v30  ;;  %v1206_v45 = vmax.f32 %v1190_v34, 0.0  ;;  %v2399_v30 = vld [vmem:[%s2958_s29 + $0x8] sm:$0xff]  }
 0x149   : > { %v1189_v42 = vadd.f32 %v2044_v17, %v1117_v41  ;;  %2234 = vmatpush3.bf16.msra.mxu1 %v2397_v16  ;;  %v1204_v47 = vmax.f32 %v1188_v36, 0.0 }
 0x14a   : > { %v1207_v46 = vmax.f32 %v1191_v40, 0.0  ;;  %2251 = vmatprep.subr.bf16.mxu1 %v2398_v19 }
 0x14b   : > { %v1205_v48 = vmax.f32 %v1189_v42, 0.0 }
 0x14c   : > { %v1219_v51 = vpack.c.bf16 %v1207_v46, %v1206_v45 }
 0x14d   : > { %v1218_v52 = vpack.c.bf16 %v1205_v48, %v1204_v47  ;;  %v2207_v53 = vpop.f32.mrb[8].mxu0 }
 0x14e   : > { %v1194_v54 = vadd.f32 %v2207_v53, %v2044_v17  ;;  %v1130_v56 = vpop.f32.mrb[9].mxu0 }
 0x14f   : > { %v1192_v57 = vadd.f32 %v2044_v17, %v1130_v56  ;;  %v2208_v58 = vpop.f32.mrb[10].mxu0  ;;  %2221 = vmatprep.mubr.msk.bf16.mxu1 %vm776_vm2, %v1218_v52 }
 0x150   : > { %v1195_v59 = vadd.f32 %v2208_v58, %v2044_v17  ;;  %v1133_v60 = vpop.f32.mrb[11].mxu0  ;;  %2222 = vmatmul.mubr.msk.bf16.gmra.mrb[4].mxu1 %vm776_vm2, %v1219_v51  ;;  %v1210_v62 = vmax.f32 %v1194_v54, 0.0 }
 0x151   : > { %v1193_v61 = vadd.f32 %v2044_v17, %v1133_v60  ;;  %v1208_v0 = vmax.f32 %v1192_v57, 0.0 }
 0x152   : > { %v1211_v63 = vmax.f32 %v1195_v59, 0.0 }
 0x153   : > { %v1209_v1 = vmax.f32 %v1193_v61, 0.0 }
 0x154   : > { %v1221_v2 = vpack.c.bf16 %v1211_v63, %v1210_v62 }
 0x155   : > { %v1220_v3 = vpack.c.bf16 %v1209_v1, %v1208_v0  ;;  %v2211_v4 = vpop.f32.mrb[12].mxu0 }
 0x156   : > { %v1198_v5 = vadd.f32 %v2211_v4, %v2044_v17  ;;  %v1146_v6 = vpop.f32.mrb[13].mxu0 }
 0x157   : > { %v1196_v7 = vadd.f32 %v2044_v17, %v1146_v6  ;;  %v2212_v8 = vpop.f32.mrb[14].mxu0  ;;  %2225 = vmatprep.mubr.msk.bf16.mxu1 %vm776_vm2, %v1220_v3 }
 0x158   : > { %v1199_v9 = vadd.f32 %v2212_v8, %v2044_v17  ;;  %v1149_v10 = vpop.f32.mrb[15].mxu0  ;;  %2226 = vmatmul.mubr.msk.bf16.gmra.mrb[8].mxu1 %vm776_vm2, %v1221_v2  ;;  %v1214_v12 = vmax.f32 %v1198_v5, 0.0 }
 0x159   : > { %v1197_v11 = vadd.f32 %v2044_v17, %v1149_v10  ;;  %v1212_v14 = vmax.f32 %v1196_v7, 0.0  ;;  %v2045_v17 = vld [vmem:[%s2959_s24] ss:$0 sm:$0xff] }
 0x15a   : > { %v1215_v13 = vmax.f32 %v1199_v9, 0.0 }
 0x15b   : > { %v1213_v15 = vmax.f32 %v1197_v11, 0.0 }
 0x15c   : > { %v1223_v16 = vpack.c.bf16 %v1215_v13, %v1214_v12 }
 0x15d   : > { %v1222_v18 = vpack.c.bf16 %v1213_v15, %v1212_v14 }
 0x15f   : > { %2229 = vmatprep.mubr.msk.bf16.mxu1 %vm776_vm2, %v1222_v18 }
 0x160   : > { %2230 = vmatmul.mubr.msk.bf16.gmra.mrb[12].mxu1 %vm776_vm2, %v1223_v16 }
 0x21b   : > { %v2219_v20 = vpop.f32.mrb[0].mxu1 }
 0x21c   : > { %v1314_v21 = vadd.f32 %v2219_v20, %v2045_v17  ;;  %v1305_v22 = vpop.f32.mrb[1].mxu1 }
 0x21d   : > { %v1306_v23 = vadd.f32 %v2045_v17, %v1305_v22  ;;  %v2220_v24 = vpop.f32.mrb[2].mxu1 }
 0x21e   : > { %1370 = vst.msk [vmem:[%s2592_s30 + $0x10] sm:$0xff] %vm1039_vm3, %v1314_v21  ;;  %v1317_v25 = vadd.f32 %v2220_v24, %v2045_v17  ;;  %v1308_v26 = vpop.f32.mrb[3].mxu1 }
 0x21f   : > { %1368 = vst.msk [vmem:[%s2592_s30] sm:$0xff] %vm1039_vm3, %v1306_v23  ;;  %v1309_v27 = vadd.f32 %v2045_v17, %v1308_v26 }
 0x220   : > { %1371 = vst.msk [vmem:[%s2592_s30 + $0x18] sm:$0xff] %vm1039_vm3, %v1317_v25  ;;  %v1389_v28 = vpack.c.bf16 %v1317_v25, %v1314_v21 }
 0x221   : > { %1369 = vst.msk [vmem:[%s2592_s30 + $0x8] sm:$0xff] %vm1039_vm3, %v1309_v27  ;;  %v1388_v29 = vpack.c.bf16 %v1309_v27, %v1306_v23 }
 0x223   : > { %v2223_v31 = vpop.f32.mrb[4].mxu1  ;;  %2235 = vmatprep.mubr.msk.bf16.mxu1 %vm1039_vm3, %v1388_v29 }
 0x224   : > { %v1330_v33 = vadd.f32 %v2223_v31, %v2045_v17  ;;  %v1321_v34 = vpop.f32.mrb[5].mxu1  ;;  %2236 = vmatmul.mubr.msk.bf16.vlgmr.msra.gmra.mrb[16].mxu1 %vm1039_vm3, %v1389_v28 }
 0x225   : > { %v1322_v35 = vadd.f32 %v2045_v17, %v1321_v34  ;;  %v2224_v36 = vpop.f32.mrb[6].mxu1  ;;  %2252 = vmatpush3.bf16.msra.mxu1 %v2398_v19 }
 0x226   : > { %1374 = vst.msk [vmem:[%s2592_s30 + $0x30] sm:$0xff] %vm1039_vm3, %v1330_v33  ;;  %v1333_v39 = vadd.f32 %v2224_v36, %v2045_v17  ;;  %v1324_v40 = vpop.f32.mrb[7].mxu1  ;;  %2253 = vmatprep.subr.bf16.mxu1 %v2399_v30 }
 0x227   : > { %1372 = vst.msk [vmem:[%s2592_s30 + $0x20] sm:$0xff] %vm1039_vm3, %v1322_v35  ;;  %v1325_v41 = vadd.f32 %v2045_v17, %v1324_v40 }
 0x228   : > { %1375 = vst.msk [vmem:[%s2592_s30 + $0x38] sm:$0xff] %vm1039_vm3, %v1333_v39  ;;  %v1391_v42 = vpack.c.bf16 %v1333_v39, %v1330_v33 }
 0x229   : > { %1373 = vst.msk [vmem:[%s2592_s30 + $0x28] sm:$0xff] %vm1039_vm3, %v1325_v41  ;;  %v1390_v45 = vpack.c.bf16 %v1325_v41, %v1322_v35  ;;  %2254 = vmatpush3.bf16.msra.mxu1 %v2399_v30 }
 0x22b   : > { %v2227_v46 = vpop.f32.mrb[8].mxu1  ;;  %2239 = vmatprep.mubr.msk.bf16.mxu1 %vm1039_vm3, %v1390_v45 }
 0x22c   : > { %v1346_v47 = vadd.f32 %v2227_v46, %v2045_v17  ;;  %v1337_v48 = vpop.f32.mrb[9].mxu1  ;;  %2240 = vmatmul.mubr.msk.bf16.gmra.mrb[20].mxu1 %vm1039_vm3, %v1391_v42 }
 0x22d   : > { %v1338_v51 = vadd.f32 %v2045_v17, %v1337_v48  ;;  %v2228_v52 = vpop.f32.mrb[10].mxu1 }
 0x22e   : > { %1378 = vst.msk [vmem:[%s2592_s30 + $0x50] sm:$0xff] %vm1039_vm3, %v1346_v47  ;;  %v1349_v53 = vadd.f32 %v2228_v52, %v2045_v17  ;;  %v1340_v54 = vpop.f32.mrb[11].mxu1 }
 0x22f   : > { %1376 = vst.msk [vmem:[%s2592_s30 + $0x40] sm:$0xff] %vm1039_vm3, %v1338_v51  ;;  %v1341_v56 = vadd.f32 %v2045_v17, %v1340_v54 }
 0x230   : > { %1379 = vst.msk [vmem:[%s2592_s30 + $0x58] sm:$0xff] %vm1039_vm3, %v1349_v53  ;;  %v1393_v57 = vpack.c.bf16 %v1349_v53, %v1346_v47 }
 0x231   : > { %1377 = vst.msk [vmem:[%s2592_s30 + $0x48] sm:$0xff] %vm1039_vm3, %v1341_v56  ;;  %v1392_v58 = vpack.c.bf16 %v1341_v56, %v1338_v51 }
 0x233   : > { %v2231_v59 = vpop.f32.mrb[12].mxu1  ;;  %2243 = vmatprep.mubr.msk.bf16.mxu1 %vm1039_vm3, %v1392_v58 }
 0x234   : > { %v1362_v60 = vadd.f32 %v2231_v59, %v2045_v17  ;;  %v1353_v61 = vpop.f32.mrb[13].mxu1  ;;  %2244 = vmatmul.mubr.msk.bf16.gmra.mrb[24].mxu1 %vm1039_vm3, %v1393_v57 }
 0x235   : > { %v1354_v62 = vadd.f32 %v2045_v17, %v1353_v61  ;;  %v2232_v63 = vpop.f32.mrb[14].mxu1 }
 0x236   : > { %1382 = vst.msk [vmem:[%s2592_s30 + $0x70] sm:$0xff] %vm1039_vm3, %v1362_v60  ;;  %v1365_v0 = vadd.f32 %v2232_v63, %v2045_v17  ;;  %v1356_v1 = vpop.f32.mrb[15].mxu1 }
 0x237   : > { %1380 = vst.msk [vmem:[%s2592_s30 + $0x60] sm:$0xff] %vm1039_vm3, %v1354_v62  ;;  %v1357_v2 = vadd.f32 %v2045_v17, %v1356_v1 }
 0x238   : > { %1383 = vst.msk [vmem:[%s2592_s30 + $0x78] sm:$0xff] %vm1039_vm3, %v1365_v0  ;;  %v1395_v3 = vpack.c.bf16 %v1365_v0, %v1362_v60 }
 0x239   : > { %1381 = vst.msk [vmem:[%s2592_s30 + $0x68] sm:$0xff] %vm1039_vm3, %v1357_v2  ;;  %v1394_v4 = vpack.c.bf16 %v1357_v2, %v1354_v62 }
 0x23b   : > { %2247 = vmatprep.mubr.msk.bf16.mxu1 %vm1039_vm3, %v1394_v4 }
 0x23c   : > { %2248 = vmatmul.mubr.msk.bf16.gmra.mrb[28].mxu1 %vm1039_vm3, %v1395_v3 }
 0x23d   : > { %2255 = vmatprep.mubr.msk.bf16.mxu1 %vm776_vm2, %v2669_v32  ;;  %v1682_v32 = vlaneseq }
 0x244   : > { %2256 = vmatmul.mubr.msk.bf16.vlgmr.msra.gmra.mrb[16].mxu1 %vm776_vm2, %v2678_v37  ;;  %v2825_v37 = vshrl.u32 %v1682_v32, 7 }
 0x245   : > { %2259 = vmatprep.mubr.msk.bf16.mxu1 %vm776_vm2, %v2680_v38  ;;  %v2832_v38 = vld [vmem:[%s2960_s25] sm:$0x1] }
 0x24c   : > { %2260 = vmatmul.mubr.msk.bf16.gmra.mrb[20].mxu1 %vm776_vm2, %v2690_v43  ;;  %v2835_v43 = vadd.s32 8, %v2825_v37 }
 0x24d   : > { %2263 = vmatprep.mubr.msk.bf16.mxu1 %vm776_vm2, %v2692_v44  ;;  %v2838_v44 = vadd.s32 16, %v2825_v37 }
 0x254   : > { %2264 = vmatmul.mubr.msk.bf16.gmra.mrb[24].mxu1 %vm776_vm2, %v2702_v49  ;;  %v2841_v49 = vadd.s32 24, %v2825_v37 }
 0x255   : > { %2267 = vmatprep.mubr.msk.bf16.mxu1 %vm776_vm2, %v2704_v50  ;;  %v2075_v50 = vld [vmem:[%s2961_s9] ss:$0 sm:$0xff] }
 0x25c   : > { %2268 = vmatmul.mubr.msk.bf16.gmra.mrb[28].mxu1 %vm776_vm2, %v2714_v55 }
 0x317   : > { %v2257_v55 = vpop.f32.mrb[16].mxu1 }
 0x318   : > { %v1643_v5 = vadd.f32 %v2257_v55, %v2075_v50  ;;  %v1571_v6 = vpop.f32.mrb[17].mxu1 }
 0x319   : > { %v1641_v7 = vadd.f32 %v2075_v50, %v1571_v6  ;;  %v2258_v8 = vpop.f32.mrb[18].mxu1 }
 0x31a   : > { %v1644_v9 = vadd.f32 %v2258_v8, %v2075_v50  ;;  %v1574_v10 = vpop.f32.mrb[19].mxu1  ;;  %v1659_v12 = vmax.f32 %v1643_v5, 0.0 }
 0x31b   : > { %v1642_v11 = vadd.f32 %v2075_v50, %v1574_v10  ;;  %v1657_v14 = vmax.f32 %v1641_v7, 0.0 }
 0x31c   : > { %v1660_v13 = vmax.f32 %v1644_v9, 0.0 }
 0x31d   : > { %v1658_v15 = vmax.f32 %v1642_v11, 0.0 }
 0x31e   : > { %v2846_v16 = vpack.c.bf16 %v1660_v13, %v1659_v12 }
 0x31f   : > { %v2848_v18 = vpack.c.bf16 %v1658_v15, %v1657_v14  ;;  %v2261_v19 = vpop.f32.mrb[20].mxu1 }
 0x320   : > { %v1647_v17 = vadd.f32 %v2261_v19, %v2075_v50  ;;  %v1587_v20 = vpop.f32.mrb[21].mxu1 }
 0x321   : > { %v1645_v21 = vadd.f32 %v2075_v50, %v1587_v20  ;;  %v2262_v22 = vpop.f32.mrb[22].mxu1 }
 0x322   : > { %v1648_v23 = vadd.f32 %v2262_v22, %v2075_v50  ;;  %v1590_v24 = vpop.f32.mrb[23].mxu1  ;;  %v1663_v26 = vmax.f32 %v1647_v17, 0.0 }
 0x323   : > { %v1646_v25 = vadd.f32 %v2075_v50, %v1590_v24  ;;  %v1661_v28 = vmax.f32 %v1645_v21, 0.0 }
 0x324   : > { %v1664_v27 = vmax.f32 %v1648_v23, 0.0 }
 0x325   : > { %v1662_v29 = vmax.f32 %v1646_v25, 0.0 }
 0x326   : > { %v2850_v30 = vpack.c.bf16 %v1664_v27, %v1663_v26 }
 0x327   : > { %v2852_v31 = vpack.c.bf16 %v1662_v29, %v1661_v28  ;;  %v2265_v33 = vpop.f32.mrb[24].mxu1 }
 0x328   : > { %v1651_v34 = vadd.f32 %v2265_v33, %v2075_v50  ;;  %v1603_v35 = vpop.f32.mrb[25].mxu1 }
 0x329   : > { %v1649_v36 = vadd.f32 %v2075_v50, %v1603_v35  ;;  %v2266_v39 = vpop.f32.mrb[26].mxu1 }
 0x32a   : > { %v1652_v40 = vadd.f32 %v2266_v39, %v2075_v50  ;;  %v1606_v41 = vpop.f32.mrb[27].mxu1  ;;  %v1667_v45 = vmax.f32 %v1651_v34, 0.0 }
 0x32b   : > { %v1650_v42 = vadd.f32 %v2075_v50, %v1606_v41  ;;  %v1665_v47 = vmax.f32 %v1649_v36, 0.0 }
 0x32c   : > { %v1668_v46 = vmax.f32 %v1652_v40, 0.0 }
 0x32d   : > { %v1666_v48 = vmax.f32 %v1650_v42, 0.0 }
 0x32e   : > { %v2854_v51 = vpack.c.bf16 %v1668_v46, %v1667_v45 }
 0x32f   : > { %v2856_v52 = vpack.c.bf16 %v1666_v48, %v1665_v47  ;;  %v2269_v53 = vpop.f32.mrb[28].mxu1 }
 0x330   : > { %v1655_v54 = vadd.f32 %v2269_v53, %v2075_v50  ;;  %v1619_v56 = vpop.f32.mrb[29].mxu1 }
 0x331   : > { %v1653_v57 = vadd.f32 %v2075_v50, %v1619_v56  ;;  %v2270_v58 = vpop.f32.mrb[30].mxu1 }
 0x332   : > { %v1656_v59 = vadd.f32 %v2270_v58, %v2075_v50  ;;  %v1622_v60 = vpop.f32.mrb[31].mxu1  ;;  %v1671_v62 = vmax.f32 %v1655_v54, 0.0 }
 0x333   : > { %v1654_v61 = vadd.f32 %v2075_v50, %v1622_v60  ;;  %v1669_v0 = vmax.f32 %v1653_v57, 0.0 }
 0x334   : > { %v1672_v63 = vmax.f32 %v1656_v59, 0.0 }
 0x335   : > { %v1670_v1 = vmax.f32 %v1654_v61, 0.0 }
 0x336   : > { %v2858_v2 = vpack.c.bf16 %v1672_v63, %v1671_v62 }
 0x337   : > { %v2860_v3 = vpack.c.bf16 %v1670_v1, %v1669_v0 }
 0x338 LB: >> { %2271 = vmatprep.subr.bf16.mxu0 %v2848_v18  ;;  %s2871_s18 = sshll.u32 %s2446_s26, 5  ;;  %v1698_v4 = vsub.s32 0, %v2825_v37  ;;  %v2449_v5 = vmov 0.0   ;;  %v2450_v8 = vmov 1.0|1.0   ;;  %vm1793_vm10 = vcmask 7168   ;;  %s2446_s26 = sphi %s2862_s26, %s1692_s26  }
 0x339   : >> { %2272 = vmatpush3.bf16.msra.mxu0 %v2848_v18  ;;  %v1694_v32 = vstv %s2871_s18  ;;  %s1776_s28 = scalar_lea.vmem %s2602_s0, %s2871_s18  ;;  %s1712_s17 = scalar_lea.vmem %s2597_s16, %s2871_s18 }
 0x33a   : >> { %2273 = vmatprep.subr.bf16.mxu0 %v2846_v16  ;;  %v1695_v50 = vsub.s32 %v2832_v38, %v1694_v32  ;;  %v1779_v11 = vld [vmem:[%s1776_s28 + $0x10] sm:$0xff]  ;;  %v1777_v12 = vld [vmem:[%s1776_s28] sm:$0xff]  ;;  %v1780_v17 = vld [vmem:[%s1776_s28 + $0x18] sm:$0xff]  ;;  %s1692_s26 = sadd.s32 1, %s2446_s26  }
 0x33b   : >> { %v1778_v20 = vld [vmem:[%s1776_s28 + $0x8] sm:$0xff]  ;;  %v1715_v25 = vld [vmem:[%s1712_s17 + $0x10] sm:$0xff]  ;;  %v1713_v26 = vld [vmem:[%s1712_s17] sm:$0xff]  ;;  %p1689_p9 = scmp.ge.s32.totalorder %s1692_s26, 2  }
 0x33c   : >> { %v1699_v55 = vrot.slane %v1695_v50, %v1698_v4  ;;  %v1716_v28 = vld [vmem:[%s1712_s17 + $0x18] sm:$0xff]  ;;  %v1714_v34 = vld [vmem:[%s1712_s17 + $0x8] sm:$0xff] }
 0x33d   : >> { %2274 = vmatpush3.bf16.msra.mxu0 %v2846_v16 }
 0x33e   : >> { %2275 = vmatprep.subr.bf16.mxu0 %v2852_v31  ;;  %vm1700_vm4 = vcmp.eq.s32.totalorder %v2825_v37, %v1699_v55  ;;  %vm1701_vm5 = vcmp.eq.s32.totalorder %v2835_v43, %v1699_v55  ;;  %vm1702_vm6 = vcmp.eq.s32.totalorder %v2838_v44, %v1699_v55  ;;  %vm1703_vm8 = vcmp.eq.s32.totalorder %v2841_v49, %v1699_v55 }
 0x33f   : >> { %vm2081_vm7 = vmpackc.low %vm1701_vm5, %vm1700_vm4  ;;  %v2079_v6 = vsel %vm1702_vm6, 1.0, %v2449_v5  ;;  %v2077_v7 = vsel %vm1700_vm4, 1.0, %v2449_v5  ;;  %v2080_v9 = vsel %vm1703_vm8, 1.0, %v2449_v5  ;;  %v2078_v10 = vsel %vm1701_vm5, 1.0, %v2449_v5 }
 0x340   : >> { %2287 = vmatprep.mubr.msk.bf16.mxu0 %vm2081_vm7, %v2450_v8  ;;  %1785 = vadd.xlane.f32.xlu1 %v2079_v6  ;;  %vm2083_vm9 = vmpackc.low %vm1703_vm8, %vm1702_vm6 }
 0x341   : >> { %2276 = vmatpush3.bf16.msra.mxu0 %v2852_v31  ;;  %1781 = vadd.xlane.f32.xlu0 %v2077_v7 }
 0x342   : >> { %2277 = vmatprep.subr.bf16.mxu0 %v2850_v30 }
 0x344   : >> { %1787 = vadd.xlane.f32.xlu1 %v2080_v9 }
 0x345   : >> { %2278 = vmatpush3.bf16.msra.mxu0 %v2850_v30  ;;  %1783 = vadd.xlane.f32.xlu0 %v2078_v10 }
 0x346   : >> { %2279 = vmatprep.subr.bf16.mxu0 %v2856_v52 }
 0x349   : >> { %2280 = vmatpush3.bf16.msra.mxu0 %v2856_v52 }
 0x34a   : >> { %2281 = vmatprep.subr.bf16.mxu0 %v2854_v51 }
 0x34d   : >> { %2282 = vmatpush3.bf16.msra.mxu0 %v2854_v51 }
 0x34e   : >> { %2283 = vmatprep.subr.bf16.mxu0 %v2860_v3 }
 0x351   : >> { %2284 = vmatpush3.bf16.msra.mxu0 %v2860_v3 }
 0x352   : >> { %2285 = vmatprep.subr.bf16.mxu0 %v2858_v2 }
 0x355   : >> { %2286 = vmatpush3.bf16.msra.mxu0 %v2858_v2 }
 0x358   : >> { %2288 = vmatmul.mubr.msk.bf16.vlgmr.msra.gmra.mrb[0].mxu0 %vm2083_vm9, %v2450_v8 }
 0x3cd   : >> { %v1786_v13 = vpop.xlane.xlu1 %1785 }
 0x3ce   : >> { %v1782_v14 = vpop.xlane.xlu0 %1781  ;;  %v1791_v15 = vadd.f32 %v1786_v13, %v1779_v11 }
 0x3cf   : >> { %v1789_v19 = vadd.f32 %v1782_v14, %v1777_v12 }
 0x3d0   : >> { %1796 = vst.msk [vmem:[%s1776_s28 + $0x10] sm:$0xff] %vm1793_vm10, %v1791_v15 }
 0x3d1   : >> { %1794 = vst.msk [vmem:[%s1776_s28] sm:$0xff] %vm1793_vm10, %v1789_v19  ;;  %v1788_v21 = vpop.xlane.xlu1 %1787 }
 0x3d2   : >> { %v1784_v22 = vpop.xlane.xlu0 %1783  ;;  %v1792_v23 = vadd.f32 %v1788_v21, %v1780_v17 }
 0x3d3   : >> { %v1790_v24 = vadd.f32 %v1784_v22, %v1778_v20 }
 0x3d4   : >> { %1797 = vst.msk [vmem:[%s1776_s28 + $0x18] sm:$0xff] %vm1793_vm10, %v1792_v23 }
 0x3d5   : >> { %1795 = vst.msk [vmem:[%s1776_s28 + $0x8] sm:$0xff] %vm1793_vm10, %v1790_v24 }
 0x42b   : >> { %v2289_v27 = vpop.f32.mrb[0].mxu0  ;;  %1691 = sbr.rel (!%p1689_p9) target bundleno = 824 (0x338), region = 148 }
 0x42c   : >> { %v1770_v29 = vadd.f32 %v2289_v27, %v1715_v25  ;;  %v1753_v33 = vpop.f32.mrb[1].mxu0 }
 0x42d   : >> { %v1768_v35 = vadd.f32 %v1753_v33, %v1713_v26  ;;  %v2290_v36 = vpop.f32.mrb[2].mxu0 }
 0x42e   : >> { %1774 = vst.msk [vmem:[%s1712_s17 + $0x10] sm:$0xff] %vm776_vm2, %v1770_v29  ;;  %v1771_v39 = vadd.f32 %v2290_v36, %v1716_v28  ;;  %v1756_v40 = vpop.f32.mrb[3].mxu0 }
 0x42f   : >> { %1772 = vst.msk [vmem:[%s1712_s17] sm:$0xff] %vm776_vm2, %v1768_v35  ;;  %v1769_v41 = vadd.f32 %v1756_v40, %v1714_v34 }
 0x430   : >> { %1775 = vst.msk [vmem:[%s1712_s17 + $0x18] sm:$0xff] %vm776_vm2, %v1771_v39 }
 0x431   : >> { %1773 = vst.msk [vmem:[%s1712_s17 + $0x8] sm:$0xff] %vm776_vm2, %v1769_v41 }
 0x432 PF: > { %s2962_s19 = sld [smem:[#allocation4_spill]]  ;;  %s2963_s18 = sld [smem:[#allocation2_spill]] }
 0x433   : > { %s2965_s20 = sld [smem:[#allocation5_spill]]  ;;  %s2966_s21 = sld [smem:[#allocation6_spill]] }
 0x438   : > { %s26_s22 = sadd.s32 1, %s2962_s19   ;;  %s2964_s19 = sld [smem:[#allocation3_spill]] }
 0x439   : > { %p23_p10 = scmp.ge.s32.totalorder %s26_s22, 6  }
 0x43b   :  { %25 = sbr.rel (!%p23_p10) target bundleno = 5 (0x5), region = 159 }

</bundles_post_ra>
